<compile_context>
chip_gen: v7x
topology: tpu7x:2x2x1
jax: 0.10.0
libtpu: 0.0.40
codegen_flags: <defaults>
</compile_context>

<pallas_src>
import jax
import jax.numpy as jnp
from jax.experimental import pallas as pl
from jax.experimental.pallas import tpu as pltpu

EMBED_DIMENSION = 64
EMBED_MAX_NORM = 1.0


def cbow_fused_kernel(tok_ref, emb_ref, w_ref, b_ref, o_ref):
    # tok_ref : VMEM i32  [B, C]       context token ids (resident, constant index_map)
    # emb_ref : VMEM f32  [V, D]       embedding table (constant index_map -> DMA'd once)
    # w_ref   : VMEM bf16 [1, D, TV]   contiguous vocab tile of the linear weight
    # b_ref   : VMEM f32  [1, TV]      bias tile
    # o_ref   : VMEM f32  [B, TV]      logits tile (lane-dense output)
    B, C = tok_ref.shape
    V, D = emb_ref.shape

    # --- Stage 1 (recomputed per tile; tiny): max_norm renorm + one-hot context mean ---
    e = emb_ref[...]                                              # (V, D)
    nrm = jnp.sqrt(jnp.sum(e * e, axis=-1, keepdims=True))        # (V, 1)
    # PyTorch renorm: max_norm / (norm + 1e-7) only where norm > max_norm.
    scale = jnp.where(nrm > EMBED_MAX_NORM, EMBED_MAX_NORM / (nrm + 1e-7), 1.0)
    e = e * scale

    tok = tok_ref[...]                                            # (B, C) int32
    vocab_iota = jax.lax.broadcasted_iota(jnp.int32, (B, V), 1)   # (B, V)
    counts = jnp.zeros((B, V), jnp.float32)
    for c in range(C):                                            # C is small and static
        counts = counts + (vocab_iota == tok[:, c:c + 1]).astype(jnp.float32)
    onehot = counts * (1.0 / C)                                   # 1/C mean folded in

    x = jnp.dot(onehot, e, preferred_element_type=jnp.float32)    # (B, D)

    # --- Stage 2: (B, D) @ (D, TV) + bias; weight streamed in bf16, f32 accumulation ---
    o_ref[...] = (
        jnp.dot(x.astype(jnp.bfloat16), w_ref[0],
                preferred_element_type=jnp.float32)
        + b_ref[...]
    ).astype(o_ref.dtype)


def cbow_forward(token_ids, emb_table, w_t, bias, *, tv=4096):
    """token_ids: int32 [B, C]; emb_table: f32 [V, D]; w_t: f32 [D, V]; bias: f32 [V] -> [B, V]."""
    B, C = token_ids.shape
    V, D = emb_table.shape
    assert w_t.shape == (D, V) and bias.shape == (V,)

    # Largest vocab tile that (a) divides V, (b) is a multiple of 128 (lane-dense
    # output stores) and (c) leaves >= 2 grid steps (v7x second TensorCore gets work).
    tv_cap = min(tv, V // 2)
    tv_sel = 0
    t = 128
    while t <= tv_cap:
        if V % t == 0:
            tv_sel = t
        t += 128
    assert tv_sel > 0, "V must have a tile divisor that is a multiple of 128 and <= V//2"
    tv = tv_sel
    nt = V // tv

    # Contiguous (nt, D, tv) bf16 weight tiles: slicing (D, tv) out of row-major (D, V)
    # would be D small strided DMA segments per tile. In a real serving path this
    # layout/cast is a one-time weight prep, not a per-call cost.
    w_tiles = w_t.reshape(D, nt, tv).transpose(1, 0, 2).astype(jnp.bfloat16)
    bias2 = bias.reshape(1, V)
    token_ids = token_ids.astype(jnp.int32)

    # VMEM budget: resident table + double-buffered weight/bias/output tiles + temporaries.
    vmem_need = (
        V * D * 4                                   # resident embedding table
        + 2 * D * tv * 2                            # bf16 weight tiles (double buffered)
        + 2 * tv * 4                                # bias tiles
        + 2 * B * tv * 4                            # output tiles
        + V * D * 4 + B * V * 4 + 2 * B * D * 4     # renormed table / one-hot / x temporaries
    )
    try:
        vmem_cap = int(pltpu.get_tpu_info().vmem_capacity_bytes)
    except Exception:
        vmem_cap = 64 * 1024 * 1024                 # conservative default (v7x per-TC)
    vmem_limit = int(min(max(4 * vmem_need, 16 * 1024 * 1024), vmem_cap // 2))

    return pl.pallas_call(
        cbow_fused_kernel,
        out_shape=jax.ShapeDtypeStruct((B, V), jnp.float32),
        grid_spec=pltpu.PrefetchScalarGridSpec(
            num_scalar_prefetch=0,
            grid=(nt,),
            in_specs=[
                pl.BlockSpec((B, C), lambda j: (0, 0)),         # token ids (resident)
                pl.BlockSpec((V, D), lambda j: (0, 0)),         # emb table (fetched once)
                pl.BlockSpec((1, D, tv), lambda j: (j, 0, 0)),  # contiguous weight tile
                pl.BlockSpec((1, tv), lambda j: (0, j)),        # bias tile
            ],
            out_specs=pl.BlockSpec((B, tv), lambda j: (0, j)),  # lane-dense (8,128) stores
        ),
        compiler_params=pltpu.CompilerParams(
            dimension_semantics=("parallel",),   # v7x: 2 TCs split the >=2 vocab tiles
            vmem_limit_bytes=vmem_limit,
        ),
    )(token_ids, emb_table, w_tiles, bias2)


def cbow_reference(token_ids, emb_table, w_t, bias):
    e = emb_table[token_ids]                                    # [B, C, D]
    nrm = jnp.sqrt(jnp.sum(e * e, axis=-1, keepdims=True))
    scale = jnp.where(nrm > EMBED_MAX_NORM, EMBED_MAX_NORM / (nrm + 1e-7), 1.0)
    e = e * scale
    x = jnp.mean(e, axis=1)                                     # [B, D]
    return x @ w_t + bias[None, :]


if __name__ == "__main__":
    VOCAB_SIZE = 512
    B = 8            # fills the 8 sublanes of the MXU LHS
    CONTEXT = 4      # CBOW context window (2 words each side)

    key = jax.random.PRNGKey(0)
    k_emb, k_w, k_b, k_idx = jax.random.split(key, 4)

    # nn.Embedding default init: N(0, 1)
    emb_table = jax.random.normal(k_emb, (VOCAB_SIZE, EMBED_DIMENSION), jnp.float32)
    # nn.Linear default init: U(-1/sqrt(in), 1/sqrt(in)); stored pre-transposed [D, V]
    bound = 1.0 / (EMBED_DIMENSION ** 0.5)
    w_t = jax.random.uniform(k_w, (EMBED_DIMENSION, VOCAB_SIZE), jnp.float32,
                             minval=-bound, maxval=bound)
    bias = jax.random.uniform(k_b, (VOCAB_SIZE,), jnp.float32,
                              minval=-bound, maxval=bound)
    token_ids = jax.random.randint(k_idx, (B, CONTEXT), 0, VOCAB_SIZE, jnp.int32)

    out = cbow_forward(token_ids, emb_table, w_t, bias)
    out = jax.block_until_ready(out)

    ref = cbow_reference(token_ids, emb_table, w_t, bias)
    assert out.shape == (B, VOCAB_SIZE)
    # The linear weight is streamed in bf16 (perf review: stage 2 is weight-bandwidth
    # bound), so compare against the f32 reference with a bf16-appropriate tolerance.
    assert jnp.allclose(out, ref, atol=1e-2, rtol=1e-2), \
        float(jnp.max(jnp.abs(out - ref)))

    print("KERNEL_OK")
</pallas_src>

<mosaic_0001>
module attributes {stable_mosaic.version = 11 : i64} {
  func.func @cbow_fused_kernel(%arg0: i32, %arg1: memref<8x4xi32, #tpu.memory_space<vmem>>, %arg2: memref<512x64xf32, #tpu.memory_space<vmem>>, %arg3: memref<1x64x256xbf16, #tpu.memory_space<vmem>>, %arg4: memref<1x256xf32, #tpu.memory_space<vmem>>, %arg5: memref<8x256xf32, #tpu.memory_space<vmem>>) attributes {dimension_semantics = [#tpu.dimension_semantics<parallel>], iteration_bounds = array<i64: 2>, scalar_prefetch = 0 : i64, scratch_operands = 0 : i64, tpu.core_type = #tpu.core_type<tc>, window_params = [{pipeline_mode = #tpu.pipeline_mode<synchronous>, transform_indices = @transform_0, window_bounds = array<i64: 8, 4>}, {pipeline_mode = #tpu.pipeline_mode<synchronous>, transform_indices = @transform_1, window_bounds = array<i64: 512, 64>}, {transform_indices = @transform_2, window_bounds = array<i64: 1, 64, 256>}, {transform_indices = @transform_3, window_bounds = array<i64: 1, 256>}, {transform_indices = @transform_4, window_bounds = array<i64: 8, 256>}]} {
    %c0 = arith.constant 0 : index
    %c0_0 = arith.constant 0 : index
    %0 = vector.load %arg2[%c0, %c0_0] : memref<512x64xf32, #tpu.memory_space<vmem>>, vector<512x64xf32>
    %1 = arith.mulf %0, %0 : vector<512x64xf32>
    %cst = arith.constant dense<0.000000e+00> : vector<512xf32>
    %2 = vector.multi_reduction <add>, %1, %cst [1] : vector<512x64xf32> to vector<512xf32>
    %3 = vector.shape_cast %2 : vector<512xf32> to vector<512x1xf32>
    %4 = math.sqrt %3 : vector<512x1xf32>
    %cst_1 = arith.constant 1.000000e+00 : f32
    %5 = vector.broadcast %cst_1 : f32 to vector<512x1xf32>
    %6 = arith.cmpf ogt, %4, %5 : vector<512x1xf32>
    %cst_2 = arith.constant 1.000000e-07 : f32
    %7 = vector.broadcast %cst_2 : f32 to vector<512x1xf32>
    %8 = arith.addf %4, %7 : vector<512x1xf32>
    %cst_3 = arith.constant 1.000000e+00 : f32
    %9 = vector.broadcast %cst_3 : f32 to vector<512x1xf32>
    %10 = arith.divf %9, %8 : vector<512x1xf32>
    %cst_4 = arith.constant 1.000000e+00 : f32
    %11 = vector.broadcast %cst_4 : f32 to vector<512x1xf32>
    %12 = arith.select %6, %10, %11 : vector<512x1xi1>, vector<512x1xf32>
    %13 = vector.broadcast %12 : vector<512x1xf32> to vector<512x64xf32>
    %14 = arith.mulf %0, %13 : vector<512x64xf32>
    %c0_5 = arith.constant 0 : index
    %c0_6 = arith.constant 0 : index
    %15 = vector.load %arg1[%c0_5, %c0_6] : memref<8x4xi32, #tpu.memory_space<vmem>>, vector<8x4xi32>
    %16 = tpu.iota {dimensions = array<i32: 1>} : vector<8x512xi32>
    %cst_7 = arith.constant 0.000000e+00 : f32
    %17 = vector.broadcast %cst_7 : f32 to vector<8x512xf32>
    %18 = vector.extract_strided_slice %15 {offsets = [0, 0], sizes = [8, 1], strides = [1, 1]} : vector<8x4xi32> to vector<8x1xi32>
    %19 = vector.broadcast %18 : vector<8x1xi32> to vector<8x512xi32>
    %20 = arith.cmpi eq, %16, %19 : vector<8x512xi32>
    %21 = arith.extui %20 : vector<8x512xi1> to vector<8x512xi32>
    %22 = arith.sitofp %21 : vector<8x512xi32> to vector<8x512xf32>
    %23 = arith.addf %17, %22 : vector<8x512xf32>
    %24 = vector.extract_strided_slice %15 {offsets = [0, 1], sizes = [8, 1], strides = [1, 1]} : vector<8x4xi32> to vector<8x1xi32>
    %25 = vector.broadcast %24 : vector<8x1xi32> to vector<8x512xi32>
    %26 = arith.cmpi eq, %16, %25 : vector<8x512xi32>
    %27 = arith.extui %26 : vector<8x512xi1> to vector<8x512xi32>
    %28 = arith.sitofp %27 : vector<8x512xi32> to vector<8x512xf32>
    %29 = arith.addf %23, %28 : vector<8x512xf32>
    %30 = vector.extract_strided_slice %15 {offsets = [0, 2], sizes = [8, 1], strides = [1, 1]} : vector<8x4xi32> to vector<8x1xi32>
    %31 = vector.broadcast %30 : vector<8x1xi32> to vector<8x512xi32>
    %32 = arith.cmpi eq, %16, %31 : vector<8x512xi32>
    %33 = arith.extui %32 : vector<8x512xi1> to vector<8x512xi32>
    %34 = arith.sitofp %33 : vector<8x512xi32> to vector<8x512xf32>
    %35 = arith.addf %29, %34 : vector<8x512xf32>
    %36 = vector.extract_strided_slice %15 {offsets = [0, 3], sizes = [8, 1], strides = [1, 1]} : vector<8x4xi32> to vector<8x1xi32>
    %37 = vector.broadcast %36 : vector<8x1xi32> to vector<8x512xi32>
    %38 = arith.cmpi eq, %16, %37 : vector<8x512xi32>
    %39 = arith.extui %38 : vector<8x512xi1> to vector<8x512xi32>
    %40 = arith.sitofp %39 : vector<8x512xi32> to vector<8x512xf32>
    %41 = arith.addf %35, %40 : vector<8x512xf32>
    %cst_8 = arith.constant 2.500000e-01 : f32
    %42 = vector.broadcast %cst_8 : f32 to vector<8x512xf32>
    %43 = arith.mulf %41, %42 : vector<8x512xf32>
    %cst_9 = arith.constant dense<0.000000e+00> : vector<8x64xf32>
    %44 = tpu.matmul %43, %14, %cst_9 {dimension_numbers = #tpu.dot_dimension_numbers<[1], [0], [0], [1], [0, 0, 1, 1], [], []>} : vector<8x512xf32>, vector<512x64xf32>, vector<8x64xf32> -> vector<8x64xf32>
    %45 = arith.truncf %44 : vector<8x64xf32> to vector<8x64xbf16>
    %c0_10 = arith.constant 0 : index
    %c0_11 = arith.constant 0 : index
    %c0_12 = arith.constant 0 : index
    %46 = vector.load %arg3[%c0_10, %c0_11, %c0_12] : memref<1x64x256xbf16, #tpu.memory_space<vmem>>, vector<1x64x256xbf16>
    %47 = vector.shape_cast %46 : vector<1x64x256xbf16> to vector<64x256xbf16>
    %cst_13 = arith.constant dense<0.000000e+00> : vector<8x256xf32>
    %48 = tpu.matmul %45, %47, %cst_13 {dimension_numbers = #tpu.dot_dimension_numbers<[1], [0], [0], [1], [0, 0, 1, 1], [], []>} : vector<8x64xbf16>, vector<64x256xbf16>, vector<8x256xf32> -> vector<8x256xf32>
    %c0_14 = arith.constant 0 : index
    %c0_15 = arith.constant 0 : index
    %49 = vector.load %arg4[%c0_14, %c0_15] : memref<1x256xf32, #tpu.memory_space<vmem>>, vector<1x256xf32>
    %50 = vector.broadcast %49 : vector<1x256xf32> to vector<8x256xf32>
    %51 = arith.addf %48, %50 : vector<8x256xf32>
    %c0_16 = arith.constant 0 : index
    %c0_17 = arith.constant 0 : index
    %52 = vector.load %arg5[%c0_16, %c0_17] : memref<8x256xf32, #tpu.memory_space<vmem>>, vector<8x256xf32>
    tpu.vector_store %arg5[%c0_16, %c0_17], %51 {strides = array<i32>} : memref<8x256xf32, #tpu.memory_space<vmem>>, vector<8x256xf32>,
    return
  }
  func.func @transform_0(%arg0: i32) -> (i32, i32) {
    %c0_i32 = arith.constant 0 : i32
    %c0_i32_0 = arith.constant 0 : i32
    %c0_i32_1 = arith.constant 0 : i32
    return %c0_i32, %c0_i32_0 : i32, i32
  }
  func.func @transform_1(%arg0: i32) -> (i32, i32) {
    %c0_i32 = arith.constant 0 : i32
    %c0_i32_0 = arith.constant 0 : i32
    %c0_i32_1 = arith.constant 0 : i32
    return %c0_i32, %c0_i32_0 : i32, i32
  }
  func.func @transform_2(%arg0: i32) -> (i32, i32, i32) {
    %c0_i32 = arith.constant 0 : i32
    %c0_i32_0 = arith.constant 0 : i32
    %c0_i32_1 = arith.constant 0 : i32
    return %arg0, %c0_i32, %c0_i32_0 : i32, i32, i32
  }
  func.func @transform_3(%arg0: i32) -> (i32, i32) {
    %c0_i32 = arith.constant 0 : i32
    %c0_i32_0 = arith.constant 0 : i32
    return %c0_i32, %arg0 : i32, i32
  }
  func.func @transform_4(%arg0: i32) -> (i32, i32) {
    %c0_i32 = arith.constant 0 : i32
    %c0_i32_0 = arith.constant 0 : i32
    return %c0_i32, %arg0 : i32, i32
  }
}

</mosaic_0001>

<bundles_post_ra>
// kernel: tpu_custom_call.1
= control target key start
LH: loop header
LB: loop body
LE: loop exit
PB: predicated region body
PF: predicated region fallthrough
CT: control target
= control target key end

     0   :  { %9 = vsyncpa [#allocation3], 0  ;;  %s4119_s0 = inlined_call_operand.vmem [shape: s32[8,4], index: 0, kind: input, shape index: {}]   ;;  %s4120_s1 = inlined_call_operand.vmem [shape: f32[512,64], index: 1, kind: input, shape index: {}]   ;;  %s4121_s2 = inlined_call_operand.vmem [shape: bf16[2,64,256], index: 2, kind: input, shape index: {}]   ;;  %s4122_s3 = inlined_call_operand.vmem [shape: f32[1,512], index: 3, kind: input, shape index: {}]   ;;  %s4123_s4 = inlined_call_operand.hbm [shape: f32[8,512], index: 4, kind: output, shape index: {}]  }
   0x1   :  { %11 = vsyncpa [#allocation3 + $0x1], 0  ;;  %s2423_s15 = smov 0   ;;  %s2425_s16 = smov 0  }
   0x2   :  { %s2427_s17 = smov 0   ;;  %s2429_s18 = smov 0  }
   0x3 LB: > { %s2444_s19 = sadd.s32 4294967295, %s2390_s18   ;;  %s1786_s20 = sadd.s32 4294967294, %s2390_s18   ;;  %s2390_s18 = sphi %s2429_s18, %s4129_s18   ;;  %s2386_s17 = sphi %s2427_s17, %s4128_s17   ;;  %s2382_s16 = sphi %s2425_s16, %s4127_s16   ;;  %s2378_s15 = sphi %s2423_s15, %s4126_s15  }
   0x4   : > { %s2448_s21 = sadd.s32 1, %s2390_s18   ;;  %s118_s22 = sadd.s32 1, %s2386_s17 }
   0x5   : > { %s115_s23 = ssub.s32 %s2390_s18, %s2448_s21  ;;  %p128_p0 = scmp.ne.s32.totalorder %s2386_s17, %s2382_s16 }
   0x6   : > { %p116_p1 = scmp.eq.s32.totalorder %s115_s23, 0  ;;  %p129_p2 = scmp.eq.s32.totalorder %s2444_s19, 1 }
   0x7   : > { %p134_p3 = scmp.ne.s32.totalorder %s2382_s16, %s2378_s15  ;;  %p135_p4 = scmp.eq.s32.totalorder %s1786_s20, 1 }
   0x8   : > { %s2459_s24 = scalar_select %p116_p1, %s2386_s17, %s118_s22  }
   0x9   : > { %p2461_p5 = por %p129_p2, %p128_p0  ;;  %p2465_p6 = por %p135_p4, %p134_p3 }
   0xa   : > { %p1789_p7 = scmp.ge.s32.totalorder %s2390_s18, 1  ;;  %p175_p8 = scmp.lt.s32.totalorder %s2390_s18, 3 }
   0xc   : > { %p176_p9 = pnand %p1789_p7, %p175_p8 }
   0xd   : > { %v2474_v0 = vld [vmem:[%s4120_s1 + $0x180] sm:$0xff] (!%p176_p9)  ;;  %vm345_vm0 = vcmask (!%p176_p9), 523264   ;;  %v2484_v2 = vld [vmem:[%s4120_s1 + $0x188] sm:$0xff] (!%p176_p9)  ;;  %v2536_v22 = vld [vmem:[%s4120_s1 + $0x98] sm:$0xff] (!%p176_p9)  ;;  %v2392_v60 = vmov (!%p176_p9), 1   ;;  %v2393_v61 = vmov (!%p176_p9), 0  }
   0xe   : > { %179 = sbr.rel (%p176_p9) target bundleno = 839 (0x347), region = 36  ;;  %v2479_v1 = vld [vmem:[%s4120_s1 + $0x80] sm:$0xff] (!%p176_p9)  ;;  %v329_v3 = vmul.f32 (!%p176_p9), %v2474_v0, %v2474_v0  ;;  %v330_v5 = vmul.f32 (!%p176_p9), %v2484_v2, %v2484_v2  ;;  %v2495_v6 = vld [vmem:[%s4120_s1 + $0x88] sm:$0xff] (!%p176_p9)  ;;  %v2541_v23 = vld [vmem:[%s4120_s1 + $0x90] sm:$0xff] (!%p176_p9)  ;;  %v300_v26 = vmul.f32 (!%p176_p9), %v2536_v22, %v2536_v22  ;;  %2005 = vset.pattern.permute.xlu1 (!%p176_p9), %v2392_v60  ;;  %2004 = vset.pattern.permute.xlu0 (!%p176_p9), %v2393_v61  ;;  %p205_p10 = scmp.lt.s32.totalorder (!%p176_p9), %s2444_s19, 1 }
   0xf   : > { %v297_v4 = vmul.f32 (!%p176_p9), %v2479_v1, %v2479_v1  ;;  %v298_v7 = vmul.f32 (!%p176_p9), %v2495_v6, %v2495_v6  ;;  %v2502_v8 = vld [vmem:[%s4120_s1 + $0x8] sm:$0xff] (!%p176_p9)  ;;  %v2507_v9 = vld [vmem:[%s4120_s1] sm:$0xff] (!%p176_p9)  ;;  %v299_v27 = vmul.f32 (!%p176_p9), %v2541_v23, %v2541_v23  ;;  %v2552_v28 = vld [vmem:[%s4120_s1 + $0x198] sm:$0xff] (!%p176_p9)  ;;  %s1793_s30 = sshll.u32 (!%p176_p9), %s2444_s19, 1  ;;  %s1825_s10 = sshll.u32 (!%p176_p9), %s2444_s19, 8 }
  0x10   : > { %v490_v10 = vsel (!%p176_p9), %vm345_vm0, %v329_v3, 0.0  ;;  %v493_v12 = vsel (!%p176_p9), %vm345_vm0, %v330_v5, 0.0  ;;  %v282_v14 = vmul.f32 (!%p176_p9), %v2502_v8, %v2502_v8  ;;  %v281_v15 = vmul.f32 (!%p176_p9), %v2507_v9, %v2507_v9  ;;  %v2520_v16 = vld [vmem:[%s4120_s1 + $0x108] sm:$0xff] (!%p176_p9)  ;;  %v2525_v17 = vld [vmem:[%s4120_s1 + $0x100] sm:$0xff] (!%p176_p9)  ;;  %v2557_v29 = vld [vmem:[%s4120_s1 + $0x190] sm:$0xff] (!%p176_p9)  ;;  %p211_p11 = scmp.lt.s32.totalorder (!%p176_p9), %s1793_s30, 3  ;;  %s4077_s20 = scalar_lea.hbm (!%p176_p9), %s4123_s4, %s1825_s10 }
  0x11   : > { %v394_v11 = vsel (!%p176_p9), %vm345_vm0, %v297_v4, 0.0  ;;  %491 = vadd.xlane.f32.xlu1 (!%p176_p9), %v490_v10  ;;  %v397_v13 = vsel (!%p176_p9), %vm345_vm0, %v298_v7, 0.0  ;;  %v314_v20 = vmul.f32 (!%p176_p9), %v2520_v16, %v2520_v16  ;;  %v313_v21 = vmul.f32 (!%p176_p9), %v2525_v17, %v2525_v17  ;;  %v220_v34 = vld [vmem:[%s4120_s1 + $0x18] sm:$0xff] (!%p176_p9)  ;;  %v2571_v35 = vld [vmem:[%s4120_s1 + $0x10] sm:$0xff] (!%p176_p9)  ;;  %v238_v46 = vld [vmem:[%s4120_s1 + $0xa8] sm:$0xff] (!%p176_p9) }
  0x12   : > { %395 = vadd.xlane.f32.xlu0 (!%p176_p9), %v394_v11  ;;  %v349_v18 = vsel (!%p176_p9), %vm345_vm0, %v282_v14, 0.0  ;;  %v346_v19 = vsel (!%p176_p9), %vm345_vm0, %v281_v15, 0.0  ;;  %v403_v30 = vsel (!%p176_p9), %vm345_vm0, %v300_v26, 0.0  ;;  %v400_v31 = vsel (!%p176_p9), %vm345_vm0, %v299_v27, 0.0  ;;  %v252_v40 = vld [vmem:[%s4120_s1 + $0x118] sm:$0xff] (!%p176_p9)  ;;  %v251_v41 = vld [vmem:[%s4120_s1 + $0x110] sm:$0xff] (!%p176_p9) }
  0x13   : > { %v445_v24 = vsel (!%p176_p9), %vm345_vm0, %v314_v20, 0.0  ;;  %v442_v25 = vsel (!%p176_p9), %vm345_vm0, %v313_v21, 0.0  ;;  %v332_v32 = vmul.f32 (!%p176_p9), %v2552_v28, %v2552_v28  ;;  %v331_v33 = vmul.f32 (!%p176_p9), %v2557_v29, %v2557_v29  ;;  %v237_v47 = vld [vmem:[%s4120_s1 + $0xa0] sm:$0xff] (!%p176_p9)  ;;  %v270_v52 = vld [vmem:[%s4120_s1 + $0x1a8] sm:$0xff] (!%p176_p9)  ;;  %v240_v14 = vld [vmem:[%s4120_s1 + $0xb8] sm:$0xff] (!%p176_p9) }
  0x14   : > { %v284_v38 = vmul.f32 (!%p176_p9), %v220_v34, %v220_v34  ;;  %v283_v39 = vmul.f32 (!%p176_p9), %v2571_v35, %v2571_v35  ;;  %v316_v44 = vmul.f32 (!%p176_p9), %v252_v40, %v252_v40  ;;  %v315_v45 = vmul.f32 (!%p176_p9), %v251_v41, %v251_v41  ;;  %v269_v53 = vld [vmem:[%s4120_s1 + $0x1a0] sm:$0xff] (!%p176_p9)  ;;  %v222_v58 = vld [vmem:[%s4120_s1 + $0x28] sm:$0xff] (!%p176_p9)  ;;  %v239_v15 = vld [vmem:[%s4120_s1 + $0xb0] sm:$0xff] (!%p176_p9) }
  0x15   : > { %494 = vadd.xlane.f32.xlu1 %v493_v12  ;;  %v499_v36 = vsel %vm345_vm0, %v332_v32, 0.0  ;;  %v496_v37 = vsel %vm345_vm0, %v331_v33, 0.0  ;;  %v302_v50 = vmul.f32 %v238_v46, %v238_v46  ;;  %v301_v51 = vmul.f32 %v237_v47, %v237_v47  ;;  %v221_v59 = vld [vmem:[%s4120_s1 + $0x20] sm:$0xff]  ;;  %v254_v5 = vld [vmem:[%s4120_s1 + $0x128] sm:$0xff]  ;;  %v224_v32 = vld [vmem:[%s4120_s1 + $0x38] sm:$0xff]  ;;  %s206_s23 = scalar_select %p205_p10, %s2444_s19, 1 }
  0x16   : > { %398 = vadd.xlane.f32.xlu0 %v397_v13  ;;  %v355_v42 = vsel %vm345_vm0, %v284_v38, 0.0  ;;  %v352_v43 = vsel %vm345_vm0, %v283_v39, 0.0  ;;  %v451_v48 = vsel %vm345_vm0, %v316_v44, 0.0  ;;  %v448_v49 = vsel %vm345_vm0, %v315_v45, 0.0  ;;  %v253_v7 = vld [vmem:[%s4120_s1 + $0x120] sm:$0xff]  ;;  %v223_v33 = vld [vmem:[%s4120_s1 + $0x30] sm:$0xff] }
  0x17   : > { %v334_v54 = vmul.f32 %v270_v52, %v270_v52  ;;  %v333_v55 = vmul.f32 %v269_v53, %v269_v53  ;;  %v409_v56 = vsel %vm345_vm0, %v302_v50, 0.0  ;;  %v406_v57 = vsel %vm345_vm0, %v301_v51, 0.0  ;;  %v256_v39 = vld [vmem:[%s4120_s1 + $0x138] sm:$0xff]  ;;  %v255_v40 = vld [vmem:[%s4120_s1 + $0x130] sm:$0xff]  ;;  %v242_v45 = vld [vmem:[%s4120_s1 + $0xc8] sm:$0xff]  ;;  %s1824_s29 = sshll.u32 %s206_s23, 6 }
  0x18   : > { %v286_v3 = vmul.f32 %v222_v58, %v222_v58  ;;  %v285_v4 = vmul.f32 %v221_v59, %v221_v59  ;;  %v318_v12 = vmul.f32 %v254_v5, %v254_v5  ;;  %v317_v13 = vmul.f32 %v253_v7, %v253_v7  ;;  %v241_v46 = vld [vmem:[%s4120_s1 + $0xc0] sm:$0xff]  ;;  %v274_v51 = vld [vmem:[%s4120_s1 + $0x1c8] sm:$0xff]  ;;  %s3244_s8 = scalar_lea.vmem %s4121_s2, %s1824_s29  ;;  %s4131_s30 = smov (!%p211_p11, %s1793_s30), 3 }
  0x19   : > { %350 = vadd.xlane.f32.xlu1 %v349_v18  ;;  %v505_v62 = vsel %vm345_vm0, %v334_v54, 0.0  ;;  %v502_v63 = vsel %vm345_vm0, %v333_v55, 0.0  ;;  %v304_v20 = vmul.f32 %v240_v14, %v240_v14  ;;  %v303_v21 = vmul.f32 %v239_v15, %v239_v15  ;;  %v273_v52 = vld [vmem:[%s4120_s1 + $0x1c0] sm:$0xff]  ;;  %s213_s7 = scalar_lea.vmem %s4122_s3, %s4131_s30  ;;  %s2397_s23 = smov [#allocation2]  }
  0x1a   : > { %347 = vadd.xlane.f32.xlu0 %v346_v19  ;;  %v361_v10 = vsel %vm345_vm0, %v286_v3, 0.0  ;;  %v358_v11 = vsel %vm345_vm0, %v285_v4, 0.0  ;;  %v457_v18 = vsel %vm345_vm0, %v318_v12, 0.0  ;;  %v454_v19 = vsel %vm345_vm0, %v317_v13, 0.0  ;;  %v225_v58 = vld [vmem:[%s4120_s1 + $0x40] sm:$0xff]  ;;  %v258_v3 = vld [vmem:[%s4120_s1 + $0x148] sm:$0xff] }
  0x1b   : > { %v415_v26 = vsel %vm345_vm0, %v304_v20, 0.0  ;;  %v412_v27 = vsel %vm345_vm0, %v303_v21, 0.0  ;;  %v287_v38 = vmul.f32 %v223_v33, %v223_v33  ;;  %v319_v44 = vmul.f32 %v255_v40, %v255_v40  ;;  %v257_v4 = vld [vmem:[%s4120_s1 + $0x140] sm:$0xff]  ;;  %v244_v12 = vld [vmem:[%s4120_s1 + $0xd8] sm:$0xff]  ;;  %v243_v13 = vld [vmem:[%s4120_s1 + $0xd0] sm:$0xff]  ;;  %s2332_s27 = sshll.u32 %s2397_s23, 4  ;;  %s2333_s27 = int_to_ptr.vmem [resolvable:$false] %s2332_s27 }
  0x1c   : > { %v305_v50 = vmul.f32 %v241_v46, %v241_v46  ;;  %v338_v55 = vmul.f32 %v274_v51, %v274_v51  ;;  %v276_v20 = vld [vmem:[%s4120_s1 + $0x1d8] sm:$0xff]  ;;  %v275_v21 = vld [vmem:[%s4120_s1 + $0x1d0] sm:$0xff]  ;;  %s2334_s28 = scalar_lea.vmem %s2333_s27, 512 }
  0x1d   : > { %446 = vadd.xlane.f32.xlu1 %v445_v24  ;;  %v272_v24 = vld [vmem:[%s4120_s1 + $0x1b8] sm:$0xff] }
  0x1e   : > { %443 = vadd.xlane.f32.xlu0 %v442_v25  ;;  %v271_v25 = vld [vmem:[%s4120_s1 + $0x1b0] sm:$0xff]  ;;  %v418_v54 = vsel %vm345_vm0, %v305_v50, 0.0  ;;  %v517_v59 = vsel %vm345_vm0, %v338_v55, 0.0  ;;  %v277_v50 = vld [vmem:[%s4120_s1 + $0x1e0] sm:$0xff]  ;;  %v230_v55 = vld [vmem:[%s4120_s1 + $0x68] sm:$0xff] }
  0x21   : > { %404 = vadd.xlane.f32.xlu1 %v403_v30  ;;  %v336_v30 = vmul.f32 %v272_v24, %v272_v24 }
  0x22   : > { %401 = vadd.xlane.f32.xlu0 %v400_v31  ;;  %v335_v31 = vmul.f32 %v271_v25, %v271_v25 }
  0x23   : > { %v511_v34 = vsel %vm345_vm0, %v336_v30, 0.0  ;;  %v228_v30 = vld [vmem:[%s4120_s1 + $0x58] sm:$0xff] }
  0x25   : > { %500 = vadd.xlane.f32.xlu1 %v499_v36  ;;  %v508_v36 = vsel %vm345_vm0, %v335_v31, 0.0  ;;  %v227_v31 = vld [vmem:[%s4120_s1 + $0x50] sm:$0xff] }
  0x26   : > { %497 = vadd.xlane.f32.xlu0 %v496_v37  ;;  %v288_v37 = vmul.f32 %v224_v32, %v224_v32 }
  0x28   : > { %v367_v41 = vsel %vm345_vm0, %v288_v37, 0.0  ;;  %v260_v37 = vld [vmem:[%s4120_s1 + $0x158] sm:$0xff] }
  0x29   : > { %356 = vadd.xlane.f32.xlu1 %v355_v42  ;;  %v364_v42 = vsel %vm345_vm0, %v287_v38, 0.0  ;;  %v259_v38 = vld [vmem:[%s4120_s1 + $0x150] sm:$0xff] }
  0x2a   : > { %353 = vadd.xlane.f32.xlu0 %v352_v43  ;;  %v320_v43 = vmul.f32 %v256_v39, %v256_v39 }
  0x2c   : > { %v463_v47 = vsel %vm345_vm0, %v320_v43, 0.0  ;;  %v246_v43 = vld [vmem:[%s4120_s1 + $0xe8] sm:$0xff] }
  0x2d   : > { %452 = vadd.xlane.f32.xlu1 %v451_v48  ;;  %v460_v48 = vsel %vm345_vm0, %v319_v44, 0.0  ;;  %v245_v44 = vld [vmem:[%s4120_s1 + $0xe0] sm:$0xff] }
  0x2e   : > { %449 = vadd.xlane.f32.xlu0 %v448_v49  ;;  %v306_v49 = vmul.f32 %v242_v45, %v242_v45 }
  0x30   : > { %v421_v53 = vsel %vm345_vm0, %v306_v49, 0.0  ;;  %v278_v49 = vld [vmem:[%s4120_s1 + $0x1e8] sm:$0xff] }
  0x31   : > { %410 = vadd.xlane.f32.xlu1 %v409_v56  ;;  %v337_v56 = vmul.f32 %v273_v52, %v273_v52 }
  0x32   : > { %407 = vadd.xlane.f32.xlu0 %v406_v57  ;;  %v226_v57 = vld [vmem:[%s4120_s1 + $0x48] sm:$0xff] }
  0x33   : > { %v514_v60 = vsel %vm345_vm0, %v337_v56, 0.0  ;;  %v229_v56 = vld [vmem:[%s4120_s1 + $0x60] sm:$0xff] }
  0x35   : > { %506 = vadd.xlane.f32.xlu1 %v505_v62  ;;  %v290_v62 = vmul.f32 %v226_v57, %v226_v57 }
  0x36   : > { %503 = vadd.xlane.f32.xlu0 %v502_v63  ;;  %v289_v63 = vmul.f32 %v225_v58, %v225_v58 }
  0x37   : > { %v373_v5 = vsel %vm345_vm0, %v290_v62, 0.0  ;;  %v262_v62 = vld [vmem:[%s4120_s1 + $0x168] sm:$0xff] }
  0x38   : > { %v370_v7 = vsel %vm345_vm0, %v289_v63, 0.0  ;;  %v261_v63 = vld [vmem:[%s4120_s1 + $0x160] sm:$0xff] }
  0x39   : > { %362 = vadd.xlane.f32.xlu1 %v361_v10  ;;  %v322_v10 = vmul.f32 %v258_v3, %v258_v3 }
  0x3a   : > { %359 = vadd.xlane.f32.xlu0 %v358_v11  ;;  %v321_v11 = vmul.f32 %v257_v4, %v257_v4 }
  0x3b   : > { %v469_v14 = vsel %vm345_vm0, %v322_v10, 0.0  ;;  %v248_v10 = vld [vmem:[%s4120_s1 + $0xf8] sm:$0xff] }
  0x3c   : > { %v466_v15 = vsel %vm345_vm0, %v321_v11, 0.0  ;;  %v247_v11 = vld [vmem:[%s4120_s1 + $0xf0] sm:$0xff] }
  0x3d   : > { %458 = vadd.xlane.f32.xlu1 %v457_v18  ;;  %v308_v18 = vmul.f32 %v244_v12, %v244_v12 }
  0x3e   : > { %455 = vadd.xlane.f32.xlu0 %v454_v19  ;;  %v307_v19 = vmul.f32 %v243_v13, %v243_v13 }
  0x3f   : > { %v427_v24 = vsel %vm345_vm0, %v308_v18, 0.0  ;;  %v280_v18 = vld [vmem:[%s4120_s1 + $0x1f8] sm:$0xff] }
  0x40   : > { %v424_v25 = vsel %vm345_vm0, %v307_v19, 0.0  ;;  %v279_v19 = vld [vmem:[%s4120_s1 + $0x1f0] sm:$0xff] }
  0x41   : > { %416 = vadd.xlane.f32.xlu1 %v415_v26  ;;  %v340_v26 = vmul.f32 %v276_v20, %v276_v20 }
  0x42   : > { %413 = vadd.xlane.f32.xlu0 %v412_v27  ;;  %v339_v27 = vmul.f32 %v275_v21, %v275_v21 }
  0x43   : > { %v523_v32 = vsel %vm345_vm0, %v340_v26, 0.0  ;;  %v232_v26 = vld [vmem:[%s4120_s1 + $0x78] sm:$0xff] }
  0x44   : > { %v520_v33 = vsel %vm345_vm0, %v339_v27, 0.0  ;;  %v231_v27 = vld [vmem:[%s4120_s1 + $0x70] sm:$0xff] }
  0x45   : > { %512 = vadd.xlane.f32.xlu1 %v511_v34  ;;  %v292_v34 = vmul.f32 %v228_v30, %v228_v30 }
  0x46   : > { %509 = vadd.xlane.f32.xlu0 %v508_v36  ;;  %v291_v36 = vmul.f32 %v227_v31, %v227_v31 }
  0x47   : > { %v379_v39 = vsel %vm345_vm0, %v292_v34, 0.0  ;;  %v264_v34 = vld [vmem:[%s4120_s1 + $0x178] sm:$0xff] }
  0x48   : > { %v376_v40 = vsel %vm345_vm0, %v291_v36, 0.0  ;;  %v263_v36 = vld [vmem:[%s4120_s1 + $0x170] sm:$0xff] }
  0x49   : > { %368 = vadd.xlane.f32.xlu1 %v367_v41  ;;  %v324_v41 = vmul.f32 %v260_v37, %v260_v37 }
  0x4a   : > { %365 = vadd.xlane.f32.xlu0 %v364_v42  ;;  %v323_v42 = vmul.f32 %v259_v38, %v259_v38 }
  0x4b   : > { %v475_v45 = vsel %vm345_vm0, %v324_v41, 0.0 }
  0x4c   : > { %v472_v46 = vsel %vm345_vm0, %v323_v42, 0.0 }
  0x4d   : > { %464 = vadd.xlane.f32.xlu1 %v463_v47  ;;  %v310_v47 = vmul.f32 %v246_v43, %v246_v43  ;;  %v1370_v43 = vld [vmem:[%s4119_s0] sm:$0xff] }
  0x4e   : > { %461 = vadd.xlane.f32.xlu0 %v460_v48  ;;  %v309_v48 = vmul.f32 %v245_v44, %v245_v44 }
  0x4f   : > { %v433_v51 = vsel %vm345_vm0, %v310_v47, 0.0 }
  0x50   : > { %v430_v52 = vsel %vm345_vm0, %v309_v48, 0.0  ;;  %v2394_v48 = vmov 2  }
  0x51   : > { %422 = vadd.xlane.f32.xlu1 %v421_v53  ;;  %v342_v53 = vmul.f32 %v278_v49, %v278_v49 }
  0x52   : > { %419 = vadd.xlane.f32.xlu0 %v418_v54  ;;  %v341_v54 = vmul.f32 %v277_v50, %v277_v50 }
  0x53   : > { %v529_v57 = vsel %vm345_vm0, %v342_v53, 0.0 }
  0x54   : > { %v526_v58 = vsel %vm345_vm0, %v341_v54, 0.0 }
  0x55   : > { %518 = vadd.xlane.f32.xlu1 %v517_v59  ;;  %v294_v59 = vmul.f32 %v230_v55, %v230_v55 }
  0x56   : > { %515 = vadd.xlane.f32.xlu0 %v514_v60  ;;  %v293_v60 = vmul.f32 %v229_v56, %v229_v56 }
  0x57   : > { %v385_v3 = vsel %vm345_vm0, %v294_v59, 0.0 }
  0x58   : > { %v382_v4 = vsel %vm345_vm0, %v293_v60, 0.0 }
  0x59   : > { %374 = vadd.xlane.f32.xlu1 %v373_v5  ;;  %v326_v5 = vmul.f32 %v262_v62, %v262_v62 }
  0x5a   : > { %371 = vadd.xlane.f32.xlu0 %v370_v7  ;;  %v325_v7 = vmul.f32 %v261_v63, %v261_v63 }
  0x5b   : > { %v481_v12 = vsel %vm345_vm0, %v326_v5, 0.0 }
  0x5c   : > { %v478_v13 = vsel %vm345_vm0, %v325_v7, 0.0 }
  0x5d   : > { %470 = vadd.xlane.f32.xlu1 %v469_v14  ;;  %v312_v14 = vmul.f32 %v248_v10, %v248_v10 }
  0x5e   : > { %467 = vadd.xlane.f32.xlu0 %v466_v15  ;;  %v311_v15 = vmul.f32 %v247_v11, %v247_v11 }
  0x5f   : > { %v439_v20 = vsel %vm345_vm0, %v312_v14, 0.0 }
  0x60   : > { %v436_v21 = vsel %vm345_vm0, %v311_v15, 0.0 }
  0x61   : > { %428 = vadd.xlane.f32.xlu1 %v427_v24  ;;  %v344_v24 = vmul.f32 %v280_v18, %v280_v18 }
  0x62   : > { %425 = vadd.xlane.f32.xlu0 %v424_v25  ;;  %v343_v25 = vmul.f32 %v279_v19, %v279_v19 }
  0x63   : > { %v535_v30 = vsel %vm345_vm0, %v344_v24, 0.0 }
  0x64   : > { %v532_v31 = vsel %vm345_vm0, %v343_v25, 0.0 }
  0x65   : > { %524 = vadd.xlane.f32.xlu1 %v523_v32  ;;  %v296_v32 = vmul.f32 %v232_v26, %v232_v26 }
  0x66   : > { %521 = vadd.xlane.f32.xlu0 %v520_v33  ;;  %v295_v33 = vmul.f32 %v231_v27, %v231_v27 }
  0x67   : > { %v391_v37 = vsel %vm345_vm0, %v296_v32, 0.0 }
  0x68   : > { %v388_v38 = vsel %vm345_vm0, %v295_v33, 0.0 }
  0x69   : > { %380 = vadd.xlane.f32.xlu1 %v379_v39  ;;  %v328_v39 = vmul.f32 %v264_v34, %v264_v34 }
  0x6a   : > { %377 = vadd.xlane.f32.xlu0 %v376_v40  ;;  %v327_v40 = vmul.f32 %v263_v36, %v263_v36 }
  0x6b   : > { %v487_v41 = vsel %vm345_vm0, %v328_v39, 0.0 }
  0x6c   : > { %v484_v42 = vsel %vm345_vm0, %v327_v40, 0.0 }
  0x6d   : > { %476 = vadd.xlane.f32.xlu1 %v475_v45 }
  0x6e   : > { %473 = vadd.xlane.f32.xlu0 %v472_v46 }
  0x71   : > { %434 = vadd.xlane.f32.xlu1 %v433_v51  ;;  %v2395_v51 = vmov 3  }
  0x72   : > { %431 = vadd.xlane.f32.xlu0 %v430_v52 }
  0x75   : > { %530 = vadd.xlane.f32.xlu1 %v529_v57 }
  0x76   : > { %527 = vadd.xlane.f32.xlu0 %v526_v58 }
  0x79   : > { %386 = vadd.xlane.f32.xlu1 %v385_v3 }
  0x7a   : > { %383 = vadd.xlane.f32.xlu0 %v382_v4 }
  0x7d   : > { %482 = vadd.xlane.f32.xlu1 %v481_v12 }
  0x7e   : > { %479 = vadd.xlane.f32.xlu0 %v478_v13 }
  0x81   : > { %440 = vadd.xlane.f32.xlu1 %v439_v20 }
  0x82   : > { %437 = vadd.xlane.f32.xlu0 %v436_v21 }
  0x85   : > { %536 = vadd.xlane.f32.xlu1 %v535_v30 }
  0x86   : > { %533 = vadd.xlane.f32.xlu0 %v532_v31 }
  0x89   : > { %392 = vadd.xlane.f32.xlu1 %v391_v37 }
  0x8a   : > { %389 = vadd.xlane.f32.xlu0 %v388_v38 }
  0x8d   : > { %488 = vadd.xlane.f32.xlu1 %v487_v41 }
  0x8e   : > { %485 = vadd.xlane.f32.xlu0 %v484_v42 }
  0x9e   : > { %v492_v44 = vpop.xlane.xlu1 %491  ;;  %1396 = vperm.xlu1 %2005, %v1370_v43  }
  0x9f   : > { %v396_v45 = vpop.xlane.xlu0 %395  ;;  %2021 = vrsqrt.f32 %v492_v44  ;;  %vm876_vm1 = vcmp.eq.f32.partialorder %v492_v44, inf  ;;  %v879_v63 = vand.u32 2147483648, %v492_v44  ;;  %vm878_vm4 = vcmp.eq.f32.partialorder %v492_v44, 0.0 }
  0xa0   : > { %2023 = vrsqrt.f32 %v396_v45  ;;  %vm652_vm2 = vcmp.eq.f32.partialorder %v396_v45, inf  ;;  %v655_v58 = vand.u32 2147483648, %v396_v45  ;;  %vm654_vm3 = vcmp.eq.f32.partialorder %v396_v45, 0.0 }
  0xa2   : > { %v495_v46 = vpop.xlane.xlu1 %494  ;;  %2006 = vset.pattern.permute.xlu1 %v2394_v48 }
  0xa3   : > { %v399_v47 = vpop.xlane.xlu0 %398  ;;  %2025 = vrsqrt.f32 %v495_v46  ;;  %1415 = vperm.xlu1 %2006, %v1370_v43   ;;  %vm883_vm6 = vcmp.eq.f32.partialorder %v495_v46, inf  ;;  %v886_v19 = vand.u32 2147483648, %v495_v46  ;;  %vm885_vm7 = vcmp.eq.f32.partialorder %v495_v46, 0.0 }
  0xa4   : > { %1377 = vperm.xlu0 %2004, %v1370_v43   ;;  %2027 = vrsqrt.f32 %v399_v47  ;;  %vm659_vm5 = vcmp.eq.f32.partialorder %v399_v47, inf  ;;  %v662_v14 = vand.u32 2147483648, %v399_v47  ;;  %vm661_vm8 = vcmp.eq.f32.partialorder %v399_v47, 0.0 }
  0xa6   : > { %v2783_v49 = vpop.xlane.xlu1 %350 }
  0xa7   : > { %v2785_v50 = vpop.xlane.xlu0 %347  ;;  %2029 = vrsqrt.f32 %v2783_v49  ;;  %2007 = vset.pattern.permute.xlu1 %v2395_v51  ;;  %vm547_vm10 = vcmp.eq.f32.partialorder %v2783_v49, inf  ;;  %vm549_vm12 = vcmp.eq.f32.partialorder %v2783_v49, 0.0 }
  0xa8   : > { %2008 = vset.pattern.permute.xlu0 %v2395_v51  ;;  %2031 = vrsqrt.f32 %v2785_v50  ;;  %1434 = vperm.xlu1 %2007, %v1370_v43   ;;  %vm540_vm9 = vcmp.eq.f32.partialorder %v2785_v50, inf  ;;  %v543_v36 = vand.u32 2147483648, %v2785_v50  ;;  %vm542_vm11 = vcmp.eq.f32.partialorder %v2785_v50, 0.0 }
  0xa9   : > { %v2022_v52 = vpop.eup %2021  ;;  %v550_v43 = vand.u32 2147483648, %v2783_v49 }
  0xaa   : > { %v2024_v53 = vpop.eup %2023  ;;  %v2789_v54 = vpop.xlane.xlu1 %446  ;;  %v875_v56 = vmul.f32 %v2022_v52, %v492_v44 }
  0xab   : > { %v2791_v55 = vpop.xlane.xlu0 %443  ;;  %2033 = vrsqrt.f32 %v2789_v54  ;;  %v651_v57 = vmul.f32 %v2024_v53, %v396_v45  ;;  %vm771_vm15 = vcmp.eq.f32.partialorder %v2789_v54, inf }
  0xac   : > { %2035 = vrsqrt.f32 %v2791_v55  ;;  %v877_v59 = vsel %vm876_vm1, %v492_v44, %v875_v56  ;;  %vm764_vm13 = vcmp.eq.f32.partialorder %v2791_v55, inf  ;;  %vm766_vm14 = vcmp.eq.f32.partialorder %v2791_v55, 0.0 }
  0xad   : > { %v2026_v60 = vpop.eup %2025  ;;  %v653_v62 = vsel %vm652_vm2, %v396_v45, %v651_v57  ;;  %v2801_v11 = vsel %vm878_vm4, %v879_v63, %v877_v59  ;;  %v774_v57 = vand.u32 2147483648, %v2789_v54  ;;  %vm773_vm1 = vcmp.eq.f32.partialorder %v2789_v54, 0.0 }
  0xae   : > { %v2028_v3 = vpop.eup %2027  ;;  %v2795_v4 = vpop.xlane.xlu1 %404  ;;  %v2799_v7 = vsel %vm654_vm3, %v655_v58, %v653_v62  ;;  %v882_v10 = vmul.f32 %v2026_v60, %v495_v46  ;;  %v1098_v27 = vadd.f32 1e-07, %v2801_v11  ;;  %vm1034_vm3 = vcmp.gt.f32.partialorder %v2801_v11, 1.0 }
  0xaf   : > { %v2797_v5 = vpop.xlane.xlu0 %401  ;;  %v658_v12 = vmul.f32 %v2028_v3, %v399_v47  ;;  %v1066_v15 = vadd.f32 1e-07, %v2799_v7  ;;  %vm1002_vm2 = vcmp.gt.f32.partialorder %v2799_v7, 1.0 }
  0xb0   : > { %v884_v18 = vsel %vm883_vm6, %v495_v46, %v882_v10  ;;  %2037 = vrsqrt.f32 %v2797_v5  ;;  %vm666_vm6 = vcmp.eq.f32.partialorder %v2797_v5, inf }
  0xb1   : > { %v2030_v13 = vpop.eup %2029  ;;  %v660_v26 = vsel %vm659_vm5, %v399_v47, %v658_v12  ;;  %v2811_v31 = vsel %vm885_vm7, %v886_v19, %v884_v18  ;;  %2039 = vrcp.f32 %v1066_v15  ;;  %vm673_vm7 = vcmp.eq.f32.partialorder %v2795_v4, inf }
  0xb2   : > { %v2032_v20 = vpop.eup %2031  ;;  %v546_v21 = vmul.f32 %v2030_v13, %v2783_v49  ;;  %v2805_v24 = vpop.xlane.xlu1 %500  ;;  %v2814_v32 = vsel %vm661_vm8, %v662_v14, %v660_v26  ;;  %v1099_v40 = vadd.f32 1e-07, %v2811_v31  ;;  %2041 = vrcp.f32 %v1098_v27 }
  0xb3   : > { %v2807_v25 = vpop.xlane.xlu0 %497  ;;  %v539_v30 = vmul.f32 %v2032_v20, %v2785_v50  ;;  %v1067_v34 = vadd.f32 1e-07, %v2814_v32  ;;  %2043 = vrsqrt.f32 %v2795_v4  ;;  %vm1003_vm4 = vcmp.gt.f32.partialorder %v2814_v32, 1.0 }
  0xb4   : > { %v548_v42 = vsel %vm547_vm10, %v2783_v49, %v546_v21  ;;  %v767_v49 = vand.u32 2147483648, %v2791_v55  ;;  %vm1035_vm5 = vcmp.gt.f32.partialorder %v2811_v31, 1.0  ;;  %v669_v31 = vand.u32 2147483648, %v2797_v5 }
  0xb5   : > { %v2034_v33 = vpop.eup %2033  ;;  %v541_v41 = vsel %vm540_vm9, %v2785_v50, %v539_v30  ;;  %2045 = vrcp.f32 %v1067_v34  ;;  %v2835_v47 = vsel %vm549_vm12, %v550_v43, %v548_v42  ;;  %vm668_vm10 = vcmp.eq.f32.partialorder %v2797_v5, 0.0 }
  0xb6   : > { %v2036_v37 = vpop.eup %2035  ;;  %v2820_v38 = vpop.xlane.xlu1 %356  ;;  %v770_v44 = vmul.f32 %v2034_v33, %v2789_v54  ;;  %v2831_v45 = vsel %vm542_vm11, %v543_v36, %v541_v41  ;;  %2047 = vrcp.f32 %v1099_v40  ;;  %v1051_v50 = vadd.f32 1e-07, %v2835_v47 }
  0xb7   : > { %v2822_v39 = vpop.xlane.xlu0 %353  ;;  %v763_v46 = vmul.f32 %v2036_v37, %v2791_v55  ;;  %v1050_v48 = vadd.f32 1e-07, %v2831_v45  ;;  %2049 = vrsqrt.f32 %v2805_v24  ;;  %vm986_vm8 = vcmp.gt.f32.partialorder %v2831_v45, 1.0 }
  0xb8   : > { %2051 = vrsqrt.f32 %v2807_v25  ;;  %v772_v56 = vsel %vm771_vm15, %v2789_v54, %v770_v44  ;;  %vm987_vm9 = vcmp.gt.f32.partialorder %v2835_v47, 1.0  ;;  %vm675_vm11 = vcmp.eq.f32.partialorder %v2795_v4, 0.0 }
  0xb9   : > { %2053 = vrcp.f32 %v1050_v48  ;;  %v765_v53 = vsel %vm764_vm13, %v2791_v55, %v763_v46  ;;  %v2859_v3 = vsel %vm773_vm1, %v774_v57, %v772_v56  ;;  %vm897_vm12 = vcmp.eq.f32.partialorder %v2805_v24, inf }
  0xba   : > { %v2838_v51 = vpop.xlane.xlu1 %452  ;;  %v2038_v58 = vpop.eup %2037  ;;  %2055 = vrcp.f32 %v1051_v50  ;;  %v2856_v62 = vsel %vm766_vm14, %v767_v49, %v765_v53  ;;  %v1083_v14 = vadd.f32 1e-07, %v2859_v3  ;;  %vm890_vm13 = vcmp.eq.f32.partialorder %v2807_v25, inf }
  0xbb   : > { %v2840_v52 = vpop.xlane.xlu0 %449  ;;  %v2040_v63 = vpop.eup %2039  ;;  %v1082_v55 = vadd.f32 1e-07, %v2856_v62  ;;  %2057 = vrsqrt.f32 %v2820_v38  ;;  %v665_v18 = vmul.f32 %v2038_v58, %v2797_v5  ;;  %vm1018_vm14 = vcmp.gt.f32.partialorder %v2856_v62, 1.0 }
  0xbc   : > { %v2042_v10 = vpop.eup %2041  ;;  %v1258_v13 = vsel %vm1002_vm2, %v2040_v63, 1.0  ;;  %2059 = vrsqrt.f32 %v2822_v39  ;;  %vm1019_vm15 = vcmp.gt.f32.partialorder %v2859_v3, 1.0  ;;  %vm892_vm1 = vcmp.eq.f32.partialorder %v2807_v25, 0.0 }
  0xbd   : > { %v2044_v12 = vpop.eup %2043  ;;  %v1290_v19 = vsel %vm1034_vm3, %v2042_v10, 1.0  ;;  %v1322_v27 = vmul.f32 %v1258_v13, %v2479_v1  ;;  %2061 = vrcp.f32 %v1082_v55  ;;  %v667_v1 = vsel %vm666_vm6, %v2797_v5, %v665_v18 }
  0xbe   : > { %v2852_v59 = vpop.xlane.xlu1 %410  ;;  %v672_v20 = vmul.f32 %v2044_v12, %v2795_v4  ;;  %v1354_v32 = vmul.f32 %v1290_v19, %v2474_v0  ;;  %2063 = vrcp.f32 %v1083_v14  ;;  %v676_v0 = vand.u32 2147483648, %v2795_v4 }
  0xbf   : > { %v2854_v60 = vpop.xlane.xlu0 %407  ;;  %v2046_v15 = vpop.eup %2045  ;;  %v2894_v50 = vsel %vm668_vm10, %v669_v31, %v667_v1  ;;  %2065 = vrsqrt.f32 %v2840_v52  ;;  %vm899_vm2 = vcmp.eq.f32.partialorder %v2805_v24, 0.0  ;;  %vm554_vm3 = vcmp.eq.f32.partialorder %v2822_v39, inf }
  0xc0   : > { %v2048_v7 = vpop.eup %2047  ;;  %v1259_v26 = vsel %vm1003_vm4, %v2046_v15, 1.0  ;;  %v674_v42 = vsel %vm673_vm7, %v2795_v4, %v672_v20  ;;  %v893_v4 = vand.u32 2147483648, %v2807_v25  ;;  %2067 = vrsqrt.f32 %v2838_v51 }
  0xc1   : > { %v2050_v11 = vpop.eup %2049  ;;  %v1323_v30 = vmul.f32 %v1259_v26, %v2495_v6  ;;  %v1291_v33 = vsel %vm1035_vm5, %v2048_v7, 1.0  ;;  %v2899_v53 = vsel %vm675_vm11, %v676_v0, %v674_v42  ;;  %vm561_vm4 = vcmp.eq.f32.partialorder %v2820_v38, inf }
  0xc2   : > { %v2868_v54 = vpop.xlane.xlu1 %506  ;;  %v2052_v34 = vpop.eup %2051  ;;  %v1355_v36 = vmul.f32 %v1291_v33, %v2484_v2  ;;  %v896_v47 = vmul.f32 %v2050_v11, %v2805_v24  ;;  %v1069_v58 = vadd.f32 1e-07, %v2899_v53  ;;  %vm556_vm5 = vcmp.eq.f32.partialorder %v2822_v39, 0.0 }
  0xc3   : > { %v2872_v21 = vpop.xlane.xlu0 %503  ;;  %v2054_v37 = vpop.eup %2053  ;;  %v1896_v40 = vpack.c.bf16 %v1323_v30, %v1322_v27  ;;  %v889_v49 = vmul.f32 %v2052_v34, %v2807_v25  ;;  %v557_v30 = vand.u32 2147483648, %v2822_v39  ;;  %vm785_vm6 = vcmp.eq.f32.partialorder %v2838_v51, inf }
  0xc4   : > { %v2056_v41 = vpop.eup %2055  ;;  %v1928_v6 = vpack.c.bf16 %v1355_v36, %v1354_v32  ;;  %v1242_v43 = vsel %vm986_vm8, %v2054_v37, 1.0  ;;  %v898_v55 = vsel %vm897_vm12, %v2805_v24, %v896_v47  ;;  %v564_v32 = vand.u32 2147483648, %v2820_v38 }
  0xc5   : > { %1897 = vmatprep.subr.bf16.mxu0 %v1896_v40  ;;  %v1243_v44 = vsel %vm987_vm9, %v2056_v41, 1.0  ;;  %v1306_v48 = vmul.f32 %v1242_v43, %v2507_v9  ;;  %v2058_v56 = vpop.eup %2057  ;;  %v900_v9 = vand.u32 2147483648, %v2805_v24  ;;  %v891_v12 = vsel %vm890_vm13, %v2807_v25, %v889_v49 }
  0xc6   : > { %v2887_v2 = vpop.xlane.xlu1 %362  ;;  %1929 = vmatprep.subr.bf16.mxu1 %v1928_v6  ;;  %v1307_v45 = vmul.f32 %v1243_v44, %v2502_v8  ;;  %v2060_v57 = vpop.eup %2059  ;;  %v1068_v8 = vadd.f32 1e-07, %v2894_v50  ;;  %v560_v14 = vmul.f32 %v2058_v56, %v2820_v38  ;;  %v2923_v3 = vsel %vm892_vm1, %v893_v4, %v891_v12 }
  0xc7   : > { %v2890_v46 = vpop.xlane.xlu0 %359  ;;  %v2062_v63 = vpop.eup %2061  ;;  %v553_v15 = vmul.f32 %v2060_v57, %v2822_v39  ;;  %v2925_v26 = vsel %vm899_vm2, %v900_v9, %v898_v55  ;;  %v1100_v24 = vadd.f32 1e-07, %v2923_v3  ;;  %vm563_vm7 = vcmp.eq.f32.partialorder %v2820_v38, 0.0 }
  0xc8   : > { %v1898_v5 = vpack.c.bf16 %v1307_v45, %v1306_v48  ;;  %v2064_v13 = vpop.eup %2063  ;;  %v1274_v19 = vsel %vm1018_vm14, %v2062_v63, 1.0  ;;  %2069 = vrcp.f32 %v1068_v8  ;;  %v562_v34 = vsel %vm561_vm4, %v2820_v38, %v560_v14 }
  0xc9   : > { %v1275_v7 = vsel %vm1019_vm15, %v2064_v13, 1.0  ;;  %v1338_v20 = vmul.f32 %v1274_v19, %v2525_v17  ;;  %2071 = vrcp.f32 %v1069_v58  ;;  %v555_v11 = vsel %vm554_vm3, %v2822_v39, %v553_v15  ;;  %v2066_v27 = vpop.eup %2065 }
  0xca   : > { %1899 = vmatpush3.bf16.msra.mxu0 %v1898_v5  ;;  %v2909_v10 = vpop.xlane.xlu1 %458  ;;  %v1339_v62 = vmul.f32 %v1275_v7, %v2520_v16  ;;  %2073 = vrsqrt.f32 %v2854_v60  ;;  %v1101_v16 = vadd.f32 1e-07, %v2925_v26  ;;  %v2068_v36 = vpop.eup %2067  ;;  %v2943_v37 = vsel %vm556_vm5, %v557_v30, %v555_v11 }
  0xcb   : > { %v2917_v18 = vpop.xlane.xlu0 %455  ;;  %2075 = vrsqrt.f32 %v2852_v59  ;;  %v777_v31 = vmul.f32 %v2066_v27, %v2840_v52  ;;  %v2948_v40 = vsel %vm563_vm7, %v564_v32, %v562_v34  ;;  %v1052_v1 = vadd.f32 1e-07, %v2943_v37 }
  0xcc   : > { %v1930_v25 = vpack.c.bf16 %v1339_v62, %v1338_v20  ;;  %2077 = vrcp.f32 %v1100_v24  ;;  %v788_v41 = vand.u32 2147483648, %v2838_v51  ;;  %vm778_vm8 = vcmp.eq.f32.partialorder %v2840_v52, inf }
  0xcd   : > { %2079 = vrcp.f32 %v1101_v16  ;;  %v1053_v39 = vadd.f32 1e-07, %v2948_v40  ;;  %v784_v42 = vmul.f32 %v2068_v36, %v2838_v51  ;;  %v781_v38 = vand.u32 2147483648, %v2840_v52 }
  0xce   : > { %v2931_v17 = vpop.xlane.xlu1 %416  ;;  %1931 = vmatpush3.bf16.msra.mxu1 %v1930_v25  ;;  %2081 = vrsqrt.f32 %v2868_v54  ;;  %vm1004_vm9 = vcmp.gt.f32.partialorder %v2894_v50, 1.0  ;;  %vm687_vm10 = vcmp.eq.f32.partialorder %v2852_v59, inf  ;;  %v690_v44 = vand.u32 2147483648, %v2852_v59 }
  0xcf   : > { %v2937_v33 = vpop.xlane.xlu0 %413  ;;  %2083 = vrsqrt.f32 %v2872_v21  ;;  %vm1005_vm11 = vcmp.gt.f32.partialorder %v2899_v53, 1.0  ;;  %v779_v56 = vsel %vm778_vm8, %v2840_v52, %v777_v31  ;;  %vm680_vm12 = vcmp.eq.f32.partialorder %v2854_v60, inf }
  0xd0   : > { %2085 = vrcp.f32 %v1052_v1  ;;  %v683_v57 = vand.u32 2147483648, %v2854_v60  ;;  %vm780_vm13 = vcmp.eq.f32.partialorder %v2840_v52, 0.0  ;;  %vm787_vm14 = vcmp.eq.f32.partialorder %v2838_v51, 0.0 }
  0xd1   : > { %2087 = vrcp.f32 %v1053_v39  ;;  %v2975_v9 = vsel %vm780_vm13, %v781_v38, %v779_v56  ;;  %vm1036_vm15 = vcmp.gt.f32.partialorder %v2923_v3, 1.0  ;;  %vm911_vm1 = vcmp.eq.f32.partialorder %v2868_v54, inf }
  0xd2   : > { %v2070_v6 = vpop.eup %2069  ;;  %v2958_v0 = vpop.xlane.xlu1 %512  ;;  %2089 = vrsqrt.f32 %v2887_v2  ;;  %v1084_v63 = vadd.f32 1e-07, %v2975_v9  ;;  %vm1037_vm2 = vcmp.gt.f32.partialorder %v2925_v26, 1.0  ;;  %v914_v19 = vand.u32 2147483648, %v2868_v54 }
  0xd3   : > { %v2072_v43 = vpop.eup %2071  ;;  %v1260_v48 = vsel %vm1004_vm9, %v2070_v6, 1.0  ;;  %v2963_v45 = vpop.xlane.xlu0 %509  ;;  %2091 = vrsqrt.f32 %v2890_v46  ;;  %vm988_vm3 = vcmp.gt.f32.partialorder %v2943_v37, 1.0  ;;  %vm989_vm4 = vcmp.gt.f32.partialorder %v2948_v40, 1.0 }
  0xd4   : > { %v2074_v47 = vpop.eup %2073  ;;  %v1261_v49 = vsel %vm1005_vm11, %v2072_v43, 1.0  ;;  %v1324_v50 = vmul.f32 %v1260_v48, %v2541_v23  ;;  %v786_v23 = vsel %vm785_vm6, %v2838_v51, %v784_v42  ;;  %2093 = vrsqrt.f32 %v2909_v10 }
  0xd5   : > { %v2076_v5 = vpop.eup %2075  ;;  %v1325_v53 = vmul.f32 %v1261_v49, %v2536_v22  ;;  %v679_v8 = vmul.f32 %v2074_v47, %v2854_v60  ;;  %v2982_v58 = vsel %vm787_vm14, %v788_v41, %v786_v23  ;;  %2095 = vrcp.f32 %v1084_v63 }
  0xd6   : > { %v2078_v22 = vpop.eup %2077  ;;  %v686_v52 = vmul.f32 %v2076_v5, %v2852_v59  ;;  %v2988_v12 = vpop.xlane.xlu1 %368  ;;  %v1085_v55 = vadd.f32 1e-07, %v2982_v58  ;;  %vm682_vm5 = vcmp.eq.f32.partialorder %v2854_v60, 0.0  ;;  %vm689_vm6 = vcmp.eq.f32.partialorder %v2852_v59, 0.0 }
  0xd7   : > { %v1900_v4 = vpack.c.bf16 %v1325_v53, %v1324_v50  ;;  %v2080_v13 = vpop.eup %2079  ;;  %v1292_v51 = vsel %vm1036_vm15, %v2078_v22, 1.0  ;;  %v2993_v14 = vpop.xlane.xlu0 %365  ;;  %v681_v26 = vsel %vm680_vm12, %v2854_v60, %v679_v8  ;;  %vm904_vm7 = vcmp.eq.f32.partialorder %v2872_v21, inf  ;;  %v2279_v22 = vld [vmem:[%s4120_s1 + $0x118] sm:$0xff] }
  0xd8   : > { %v2082_v15 = vpop.eup %2081  ;;  %v1293_v7 = vsel %vm1037_vm2, %v2080_v13, 1.0  ;;  %v1356_v20 = vmul.f32 %v1292_v51, %v2557_v29  ;;  %2097 = vrcp.f32 %v1085_v55  ;;  %v688_v29 = vsel %vm687_vm10, %v2852_v59, %v686_v52  ;;  %v2277_v59 = vld [vmem:[%s4120_s1 + $0x18] sm:$0xff] }
  0xd9   : > { %1901 = vmatprep.subr.bf16.mxu0 %v1900_v4  ;;  %v2084_v62 = vpop.eup %2083  ;;  %2099 = vrsqrt.f32 %v2917_v18  ;;  %v1357_v3 = vmul.f32 %v1293_v7, %v2552_v28  ;;  %v3009_v11 = vsel %vm682_vm5, %v683_v57, %v681_v26  ;;  %v3011_v27 = vsel %vm689_vm6, %v690_v44, %v688_v29 }
  0xda   : > { %v2086_v25 = vpop.eup %2085  ;;  %v910_v34 = vmul.f32 %v2082_v15, %v2868_v54  ;;  %v903_v32 = vmul.f32 %v2084_v62, %v2872_v21  ;;  %v3016_v37 = vpop.xlane.xlu1 %464  ;;  %2101 = vrsqrt.f32 %v2931_v17  ;;  %v1070_v1 = vadd.f32 1e-07, %v3009_v11 }
  0xdb   : > { %v2088_v24 = vpop.eup %2087  ;;  %v1932_v16 = vpack.c.bf16 %v1357_v3, %v1356_v20  ;;  %v1244_v28 = vsel %vm988_vm3, %v2086_v25, 1.0  ;;  %v3022_v40 = vpop.xlane.xlu0 %461  ;;  %v1071_v41 = vadd.f32 1e-07, %v3011_v27  ;;  %vm575_vm8 = vcmp.eq.f32.partialorder %v2887_v2, inf }
  0xdc   : > { %v2090_v30 = vpop.eup %2089  ;;  %v1245_v36 = vsel %vm989_vm4, %v2088_v24, 1.0  ;;  %v1308_v60 = vmul.f32 %v1244_v28, %v2571_v35  ;;  %v907_v35 = vand.u32 2147483648, %v2872_v21  ;;  %2103 = vrsqrt.f32 %v2937_v33 }
  0xdd   : > { %1933 = vmatprep.subr.bf16.mxu1 %v1932_v16  ;;  %v1309_v31 = vmul.f32 %v2277_v59, %v1245_v36  ;;  %v2092_v39 = vpop.eup %2091  ;;  %v574_v6 = vmul.f32 %v2090_v30, %v2887_v2  ;;  %v578_v42 = vand.u32 2147483648, %v2887_v2  ;;  %2105 = vrcp.f32 %v1070_v1 }
  0xde   : > { %v2094_v43 = vpop.eup %2093  ;;  %2107 = vrcp.f32 %v1071_v41  ;;  %v905_v44 = vsel %vm904_vm7, %v2872_v21, %v903_v32  ;;  %vm906_vm9 = vcmp.eq.f32.partialorder %v2872_v21, 0.0  ;;  %v912_v48 = vsel %vm911_vm1, %v2868_v54, %v910_v34  ;;  %v3043_v57 = vpop.xlane.xlu1 %422 }
  0xdf   : > { %v1902_v38 = vpack.c.bf16 %v1309_v31, %v1308_v60  ;;  %v2096_v47 = vpop.eup %2095  ;;  %v567_v49 = vmul.f32 %v2092_v39, %v2890_v46  ;;  %vm1020_vm10 = vcmp.gt.f32.partialorder %v2975_v9, 1.0  ;;  %v3039_v50 = vsel %vm906_vm9, %v907_v35, %v905_v44  ;;  %v2278_v9 = vld [vmem:[%s4120_s1 + $0x110] sm:$0xff] }
  0xe0   : > { %vm913_vm11 = vcmp.eq.f32.partialorder %v2868_v54, 0.0  ;;  %vm1021_vm12 = vcmp.gt.f32.partialorder %v2982_v58, 1.0  ;;  %v1276_v5 = vsel %vm1020_vm10, %v2096_v47, 1.0  ;;  %v1102_v53 = vadd.f32 1e-07, %v3039_v50  ;;  %v3052_v54 = vpop.xlane.xlu0 %419 }
  0xe1   : > { %1903 = vmatpush3.bf16.msra.mxu0 %v1902_v38  ;;  %v3045_v21 = vsel %vm913_vm11, %v914_v19, %v912_v48  ;;  %2109 = vrsqrt.f32 %v2958_v0  ;;  %v1340_v4 = vmul.f32 %v2278_v9, %v1276_v5  ;;  %vm568_vm13 = vcmp.eq.f32.partialorder %v2890_v46, inf }
  0xe2   : > { %v2098_v56 = vpop.eup %2097  ;;  %v1103_v58 = vadd.f32 1e-07, %v3045_v21  ;;  %v571_v63 = vand.u32 2147483648, %v2890_v46  ;;  %2111 = vrcp.f32 %v1102_v53  ;;  %vm799_vm14 = vcmp.eq.f32.partialorder %v2909_v10, inf  ;;  %v3075_v25 = vpop.xlane.xlu1 %518 }
  0xe3   : > { %v2100_v23 = vpop.eup %2099  ;;  %v1277_v8 = vsel %vm1021_vm12, %v2098_v56, 1.0  ;;  %v802_v55 = vand.u32 2147483648, %v2909_v10  ;;  %vm792_vm15 = vcmp.eq.f32.partialorder %v2917_v18, inf  ;;  %v569_v51 = vsel %vm568_vm13, %v2890_v46, %v567_v49  ;;  %v2282_v56 = vld [vmem:[%s4120_s1 + $0x1a0] sm:$0xff] }
  0xe4   : > { %v1341_v52 = vmul.f32 %v2279_v22, %v1277_v8  ;;  %2113 = vrcp.f32 %v1103_v58  ;;  %vm570_vm1 = vcmp.eq.f32.partialorder %v2890_v46, 0.0  ;;  %v2102_v15 = vpop.eup %2101  ;;  %v795_v19 = vand.u32 2147483648, %v2917_v18 }
  0xe5   : > { %2115 = vrsqrt.f32 %v2963_v45  ;;  %v3067_v7 = vsel %vm570_vm1, %v571_v63, %v569_v51  ;;  %v576_v20 = vsel %vm575_vm8, %v2887_v2, %v574_v6  ;;  %vm577_vm2 = vcmp.eq.f32.partialorder %v2887_v2, 0.0  ;;  %v3083_v2 = vpop.xlane.xlu0 %515 }
  0xe6   : > { %v1934_v13 = vpack.c.bf16 %v1341_v52, %v1340_v4  ;;  %v2104_v62 = vpop.eup %2103  ;;  %v791_v3 = vmul.f32 %v2100_v23, %v2917_v18  ;;  %v704_v26 = vand.u32 2147483648, %v2931_v17  ;;  %v3077_v46 = vsel %vm577_vm2, %v578_v42, %v576_v20  ;;  %v3108_v38 = vpop.xlane.xlu1 %374  ;;  %v2283_v23 = vld [vmem:[%s4120_s1 + $0x1a8] sm:$0xff] }
  0xe7   : > { %v1054_v29 = vadd.f32 1e-07, %v3067_v7  ;;  %v2106_v24 = vpop.eup %2105  ;;  %v798_v16 = vmul.f32 %v2094_v43, %v2909_v10  ;;  %2117 = vrsqrt.f32 %v2988_v12  ;;  %vm1006_vm3 = vcmp.gt.f32.partialorder %v3009_v11, 1.0  ;;  %v2280_v11 = vld [vmem:[%s4120_s1 + $0xa0] sm:$0xff] }
  0xe8   : > { %1935 = vmatpush3.bf16.msra.mxu1 %v1934_v13  ;;  %v1055_v28 = vadd.f32 1e-07, %v3077_v46  ;;  %v2108_v30 = vpop.eup %2107  ;;  %vm694_vm4 = vcmp.eq.f32.partialorder %v2937_v33, inf  ;;  %vm1007_vm5 = vcmp.gt.f32.partialorder %v3011_v27, 1.0  ;;  %v1262_v34 = vsel %vm1006_vm3, %v2106_v24, 1.0  ;;  %v2281_v27 = vld [vmem:[%s4120_s1 + $0xa8] sm:$0xff] }
  0xe9   : > { %2119 = vrcp.f32 %v1054_v29  ;;  %vm701_vm6 = vcmp.eq.f32.partialorder %v2931_v17, inf  ;;  %v697_v32 = vand.u32 2147483648, %v2937_v33  ;;  %v1263_v36 = vsel %vm1007_vm5, %v2108_v30, 1.0  ;;  %v3116_v47 = vpop.xlane.xlu0 %371  ;;  %v2284_v24 = vld [vmem:[%s4120_s1 + $0x20] sm:$0xff] }
  0xea   : > { %v1326_v60 = vmul.f32 %v2280_v11, %v1262_v34  ;;  %2121 = vrcp.f32 %v1055_v28  ;;  %v700_v59 = vmul.f32 %v2102_v15, %v2931_v17  ;;  %v1327_v31 = vmul.f32 %v2281_v27, %v1263_v36  ;;  %v3139_v13 = vpop.xlane.xlu1 %470 }
  0xeb   : > { %2123 = vrsqrt.f32 %v2993_v14  ;;  %v793_v1 = vsel %vm792_vm15, %v2917_v18, %v791_v3  ;;  %v2110_v41 = vpop.eup %2109  ;;  %v693_v39 = vmul.f32 %v2104_v62, %v2937_v33  ;;  %vm794_vm7 = vcmp.eq.f32.partialorder %v2917_v18, 0.0 }
  0xec   : > { %v800_v35 = vsel %vm799_vm14, %v2909_v10, %v798_v16  ;;  %vm801_vm8 = vcmp.eq.f32.partialorder %v2909_v10, 0.0  ;;  %v2112_v6 = vpop.eup %2111  ;;  %v1904_v42 = vpack.c.bf16 %v1327_v31, %v1326_v60  ;;  %vm1038_vm9 = vcmp.gt.f32.partialorder %v3039_v50, 1.0 }
  0xed   : > { %v3110_v43 = vsel %vm794_vm7, %v795_v19, %v793_v1  ;;  %v3112_v44 = vsel %vm801_vm8, %v802_v55, %v800_v35  ;;  %2125 = vrsqrt.f32 %v3016_v37  ;;  %vm1039_vm10 = vcmp.gt.f32.partialorder %v3045_v21, 1.0  ;;  %v3148_v62 = vpop.xlane.xlu0 %467 }
  0xee   : > { %v2114_v48 = vpop.eup %2113  ;;  %v1294_v18 = vsel %vm1038_vm9, %v2112_v6, 1.0  ;;  %v1086_v10 = vadd.f32 1e-07, %v3110_v43  ;;  %2127 = vrsqrt.f32 %v3022_v40  ;;  %1905 = vmatprep.subr.bf16.mxu0 %v1904_v42  ;;  %v1087_v53 = vadd.f32 1e-07, %v3112_v44  ;;  %v3174_v31 = vpop.xlane.xlu1 %428 }
  0xef   : > { %v2116_v49 = vpop.eup %2115  ;;  %v1295_v50 = vsel %vm1039_vm10, %v2114_v48, 1.0  ;;  %v1358_v5 = vmul.f32 %v2282_v56, %v1294_v18  ;;  %vm925_vm11 = vcmp.eq.f32.partialorder %v2958_v0, inf  ;;  %v928_v21 = vand.u32 2147483648, %v2958_v0 }
  0xf0   : > { %vm918_vm12 = vcmp.eq.f32.partialorder %v2963_v45, inf  ;;  %v1359_v8 = vmul.f32 %v2283_v23, %v1295_v50  ;;  %2129 = vrcp.f32 %v1086_v10  ;;  %v924_v9 = vmul.f32 %v2110_v41, %v2958_v0  ;;  %v2286_v10 = vld [vmem:[%s4120_s1 + $0x120] sm:$0xff] }
  0xf1   : > { %v921_v4 = vand.u32 2147483648, %v2963_v45  ;;  %2131 = vrcp.f32 %v1087_v53  ;;  %v695_v58 = vsel %vm694_vm4, %v2937_v33, %v693_v39  ;;  %v2118_v63 = vpop.eup %2117  ;;  %v917_v22 = vmul.f32 %v2116_v49, %v2963_v45  ;;  %v3183_v35 = vpop.xlane.xlu0 %425 }
  0xf2   : > { %2133 = vrsqrt.f32 %v3043_v57  ;;  %v1936_v52 = vpack.c.bf16 %v1359_v8, %v1358_v5  ;;  %vm696_vm13 = vcmp.eq.f32.partialorder %v2937_v33, 0.0  ;;  %vm990_vm14 = vcmp.gt.f32.partialorder %v3067_v7, 1.0  ;;  %v2287_v5 = vld [vmem:[%s4120_s1 + $0x128] sm:$0xff] }
  0xf3   : > { %v2120_v55 = vpop.eup %2119  ;;  %v3141_v51 = vsel %vm696_vm13, %v697_v32, %v695_v58  ;;  %v702_v15 = vsel %vm701_vm6, %v2931_v17, %v700_v59  ;;  %vm703_vm15 = vcmp.eq.f32.partialorder %v2931_v17, 0.0  ;;  %vm991_vm1 = vcmp.gt.f32.partialorder %v3077_v46, 1.0  ;;  %v2285_v17 = vld [vmem:[%s4120_s1 + $0x28] sm:$0xff]  ;;  %v3210_v58 = vpop.xlane.xlu1 %524 }
  0xf4   : > { %v2122_v19 = vpop.eup %2121  ;;  %1937 = vmatprep.subr.bf16.mxu1 %v1936_v52  ;;  %v1246_v20 = vsel %vm990_vm14, %v2120_v55, 1.0  ;;  %v3152_v33 = vsel %vm703_vm15, %v704_v26, %v702_v15  ;;  %v1072_v7 = vadd.f32 1e-07, %v3141_v51  ;;  %2135 = vrsqrt.f32 %v3052_v54 }
  0xf5   : > { %v2124_v3 = vpop.eup %2123  ;;  %v1247_v29 = vsel %vm991_vm1, %v2122_v19, 1.0  ;;  %v1310_v16 = vmul.f32 %v2284_v24, %v1246_v20  ;;  %v1073_v46 = vadd.f32 1e-07, %v3152_v33  ;;  %vm589_vm2 = vcmp.eq.f32.partialorder %v2988_v12, inf  ;;  %v3219_v52 = vpop.xlane.xlu0 %521  ;;  %v2288_v20 = vld [vmem:[%s4120_s1 + $0xb0] sm:$0xff] }
  0xf6   : > { %v592_v28 = vand.u32 2147483648, %v2988_v12  ;;  %v1311_v26 = vmul.f32 %v2285_v17, %v1247_v29  ;;  %2137 = vrcp.f32 %v1072_v7  ;;  %vm582_vm3 = vcmp.eq.f32.partialorder %v2993_v14, inf }
  0xf7   : > { %v585_v30 = vand.u32 2147483648, %v2993_v14  ;;  %v816_v34 = vand.u32 2147483648, %v3016_v37  ;;  %2139 = vrcp.f32 %v1073_v46  ;;  %v2126_v32 = vpop.eup %2125  ;;  %v588_v36 = vmul.f32 %v2118_v63, %v2988_v12 }
  0xf8   : > { %v809_v11 = vand.u32 2147483648, %v3022_v40  ;;  %v1906_v60 = vpack.c.bf16 %v1311_v26, %v1310_v16  ;;  %v919_v59 = vsel %vm918_vm12, %v2963_v45, %v917_v22  ;;  %v2128_v27 = vpop.eup %2127  ;;  %2141 = vrsqrt.f32 %v3075_v25  ;;  %v2289_v16 = vld [vmem:[%s4120_s1 + $0xb8] sm:$0xff] }
  0xf9   : > { %vm920_vm4 = vcmp.eq.f32.partialorder %v2963_v45, 0.0  ;;  %v926_v1 = vsel %vm925_vm11, %v2958_v0, %v924_v9  ;;  %vm927_vm5 = vcmp.eq.f32.partialorder %v2958_v0, 0.0  ;;  %v581_v39 = vmul.f32 %v2124_v3, %v2993_v14 }
  0xfa   : > { %v2130_v41 = vpop.eup %2129  ;;  %1907 = vmatpush3.bf16.msra.mxu0 %v1906_v60  ;;  %vm1022_vm6 = vcmp.gt.f32.partialorder %v3110_v43, 1.0  ;;  %v3185_v6 = vsel %vm920_vm4, %v921_v4, %v919_v59  ;;  %v3187_v42 = vsel %vm927_vm5, %v928_v21, %v926_v1  ;;  %vm806_vm7 = vcmp.eq.f32.partialorder %v3022_v40, inf  ;;  %v3252_v60 = vpop.xlane.xlu1 %380 }
  0xfb   : > { %v2132_v48 = vpop.eup %2131  ;;  %2143 = vrsqrt.f32 %v3083_v2  ;;  %vm1023_vm8 = vcmp.gt.f32.partialorder %v3112_v44, 1.0  ;;  %v1278_v0 = vsel %vm1022_vm6, %v2130_v41, 1.0  ;;  %v1104_v45 = vadd.f32 1e-07, %v3185_v6 }
  0xfc   : > { %v2134_v18 = vpop.eup %2133  ;;  %vm813_vm9 = vcmp.eq.f32.partialorder %v3016_v37, inf  ;;  %2145 = vrsqrt.f32 %v3108_v38  ;;  %v1279_v43 = vsel %vm1023_vm8, %v2132_v48, 1.0  ;;  %v1342_v49 = vmul.f32 %v2286_v10, %v1278_v0 }
  0xfd   : > { %v1105_v50 = vadd.f32 1e-07, %v3187_v42  ;;  %v718_v56 = vand.u32 2147483648, %v3043_v57  ;;  %v711_v44 = vand.u32 2147483648, %v3052_v54  ;;  %v1343_v53 = vmul.f32 %v2287_v5, %v1279_v43 }
  0xfe   : > { %2147 = vrcp.f32 %v1104_v45  ;;  %v812_v21 = vmul.f32 %v2126_v32, %v3016_v37  ;;  %v805_v23 = vmul.f32 %v2128_v27, %v3022_v40  ;;  %v583_v8 = vsel %vm582_vm3, %v2993_v14, %v581_v39  ;;  %v2136_v9 = vpop.eup %2135  ;;  %v3262_v39 = vpop.xlane.xlu0 %377 }
  0xff   : > { %2149 = vrcp.f32 %v1105_v50  ;;  %v1938_v4 = vpack.c.bf16 %v1343_v53, %v1342_v49  ;;  %vm584_vm10 = vcmp.eq.f32.partialorder %v2993_v14, 0.0  ;;  %v590_v63 = vsel %vm589_vm2, %v2988_v12, %v588_v36 }
 0x100   : > { %vm591_vm11 = vcmp.eq.f32.partialorder %v2988_v12, 0.0  ;;  %v2138_v22 = vpop.eup %2137  ;;  %2151 = vrsqrt.f32 %v3116_v47  ;;  %vm1008_vm12 = vcmp.gt.f32.partialorder %v3141_v51, 1.0  ;;  %v3221_v55 = vsel %vm584_vm10, %v585_v30, %v583_v8 }
 0x101   : > { %v3223_v15 = vsel %vm591_vm11, %v592_v28, %v590_v63  ;;  %v2140_v19 = vpop.eup %2139  ;;  %vm708_vm13 = vcmp.eq.f32.partialorder %v3052_v54, inf  ;;  %2153 = vrsqrt.f32 %v3139_v13  ;;  %1939 = vmatpush3.bf16.msra.mxu1 %v1938_v4  ;;  %vm1009_vm14 = vcmp.gt.f32.partialorder %v3152_v33, 1.0 }
 0x102   : > { %v1264_v12 = vsel %vm1008_vm12, %v2138_v22, 1.0  ;;  %v1056_v14 = vadd.f32 1e-07, %v3221_v55  ;;  %vm715_vm15 = vcmp.eq.f32.partialorder %v3043_v57, inf  ;;  %2155 = vrsqrt.f32 %v3148_v62  ;;  %v2142_v29 = vpop.eup %2141 }
 0x103   : > { %v1265_v51 = vsel %vm1009_vm14, %v2140_v19, 1.0  ;;  %v1328_v7 = vmul.f32 %v2288_v20, %v1264_v12  ;;  %v1057_v3 = vadd.f32 1e-07, %v3223_v15  ;;  %v942_v24 = vand.u32 2147483648, %v3075_v25  ;;  %v3303_v12 = vpop.xlane.xlu0 %473 }
 0x104   : > { %v935_v33 = vand.u32 2147483648, %v3083_v2  ;;  %v1329_v46 = vmul.f32 %v2289_v16, %v1265_v51  ;;  %2157 = vrcp.f32 %v1056_v14  ;;  %v714_v28 = vmul.f32 %v2134_v18, %v3043_v57 }
 0x105   : > { %v707_v17 = vmul.f32 %v2136_v9, %v3052_v54  ;;  %2159 = vrcp.f32 %v1057_v3  ;;  %v807_v26 = vsel %vm806_vm7, %v3022_v40, %v805_v23  ;;  %v2144_v30 = vpop.eup %2143  ;;  %v606_v32 = vand.u32 2147483648, %v3108_v38  ;;  %v3294_v9 = vpop.xlane.xlu1 %476 }
 0x106   : > { %v1908_v36 = vpack.c.bf16 %v1329_v46, %v1328_v7  ;;  %vm808_vm1 = vcmp.eq.f32.partialorder %v3022_v40, 0.0  ;;  %v814_v59 = vsel %vm813_vm9, %v3016_v37, %v812_v21  ;;  %v2146_v27 = vpop.eup %2145  ;;  %v3259_v1 = vmul.f32 %v2142_v29, %v3075_v25 }
 0x107   : > { %v599_v41 = vand.u32 2147483648, %v3116_v47  ;;  %v3266_v48 = vsel %vm808_vm1, %v809_v11, %v807_v26  ;;  %vm815_vm2 = vcmp.eq.f32.partialorder %v3016_v37, 0.0  ;;  %2161 = vrsqrt.f32 %v3174_v31  ;;  %v2290_v37 = vld [vmem:[%s4120_s1 + $0x1b0] sm:$0xff] }
 0x108   : > { %v2148_v0 = vpop.eup %2147  ;;  %1909 = vmatprep.subr.bf16.mxu0 %v1908_v36  ;;  %vm1040_vm3 = vcmp.gt.f32.partialorder %v3185_v6, 1.0  ;;  %v3273_v45 = vsel %vm815_vm2, %v816_v34, %v814_v59  ;;  %v1088_v18 = vadd.f32 1e-07, %v3266_v48  ;;  %vm932_vm4 = vcmp.eq.f32.partialorder %v3083_v2, inf }
 0x109   : > { %v2150_v43 = vpop.eup %2149  ;;  %2163 = vrsqrt.f32 %v3183_v35  ;;  %vm1041_vm5 = vcmp.gt.f32.partialorder %v3187_v42, 1.0  ;;  %v1296_v40 = vsel %vm1040_vm3, %v2148_v0, 1.0  ;;  %v1089_v11 = vadd.f32 1e-07, %v3273_v45  ;;  %v2291_v42 = vld [vmem:[%s4120_s1 + $0x1b8] sm:$0xff]  ;;  %v3343_v0 = vpop.xlane.xlu0 %431 }
 0x10a   : > { %vm939_vm6 = vcmp.eq.f32.partialorder %v3075_v25, inf  ;;  %v830_v6 = vand.u32 2147483648, %v3139_v13  ;;  %v1297_v10 = vsel %vm1041_vm5, %v2150_v43, 1.0  ;;  %v1360_v34 = vmul.f32 %v2290_v37, %v1296_v40  ;;  %v2152_v49 = vpop.eup %2151 }
 0x10b   : > { %2165 = vrcp.f32 %v1088_v18  ;;  %v823_v50 = vand.u32 2147483648, %v3148_v62  ;;  %v1361_v5 = vmul.f32 %v2291_v42, %v1297_v10  ;;  %v709_v53 = vsel %vm708_vm13, %v3052_v54, %v707_v17  ;;  %v2154_v21 = vpop.eup %2153 }
 0x10c   : > { %2167 = vrcp.f32 %v1089_v11  ;;  %v931_v23 = vmul.f32 %v2144_v30, %v3083_v2  ;;  %v732_v8 = vand.u32 2147483648, %v3174_v31  ;;  %vm710_vm7 = vcmp.eq.f32.partialorder %v3052_v54, 0.0  ;;  %v2156_v63 = vpop.eup %2155  ;;  %v3337_v30 = vpop.xlane.xlu1 %434 }
 0x10d   : > { %v716_v4 = vsel %vm715_vm15, %v3043_v57, %v714_v28  ;;  %v3301_v22 = vmul.f32 %v2146_v27, %v3108_v38  ;;  %v1940_v19 = vpack.c.bf16 %v1361_v5, %v1360_v34  ;;  %v3307_v14 = vsel %vm710_vm7, %v711_v44, %v709_v53 }
 0x10e   : > { %vm717_vm8 = vcmp.eq.f32.partialorder %v3043_v57, 0.0  ;;  %v2158_v51 = vpop.eup %2157  ;;  %2169 = vrsqrt.f32 %v3210_v58  ;;  %vm992_vm9 = vcmp.gt.f32.partialorder %v3221_v55, 1.0  ;;  %v1074_v7 = vadd.f32 1e-07, %v3307_v14 }
 0x10f   : > { %v3314_v20 = vsel %vm717_vm8, %v718_v56, %v716_v4  ;;  %v2160_v3 = vpop.eup %2159  ;;  %vm596_vm10 = vcmp.eq.f32.partialorder %v3116_v47, inf  ;;  %2171 = vrsqrt.f32 %v3219_v52  ;;  %1941 = vmatprep.subr.bf16.mxu1 %v1940_v19  ;;  %vm993_vm11 = vcmp.gt.f32.partialorder %v3223_v15, 1.0  ;;  %v2292_v56 = vld [vmem:[%s4120_s1 + $0x30] sm:$0xff]  ;;  %v2293_v15 = vld [vmem:[%s4120_s1 + $0x38] sm:$0xff] }
 0x110   : > { %v1248_v54 = vsel %vm992_vm9, %v2158_v51, 1.0  ;;  %v1075_v44 = vadd.f32 1e-07, %v3314_v20  ;;  %vm603_vm12 = vcmp.eq.f32.partialorder %v3108_v38, inf  ;;  %v595_v55 = vmul.f32 %v2152_v49, %v3116_v47  ;;  %v3387_v51 = vpop.xlane.xlu0 %527 }
 0x111   : > { %v1249_v57 = vsel %vm993_vm11, %v2160_v3, 1.0  ;;  %v1312_v29 = vmul.f32 %v2292_v56, %v1248_v54  ;;  %2173 = vrcp.f32 %v1074_v7  ;;  %v3327_v16 = vmul.f32 %v2154_v21, %v3139_v13  ;;  %v2162_v17 = vpop.eup %2161 }
 0x112   : > { %v725_v46 = vand.u32 2147483648, %v3183_v35  ;;  %v1313_v28 = vmul.f32 %v2293_v15, %v1249_v57  ;;  %2175 = vrcp.f32 %v1075_v44  ;;  %v3334_v26 = vmul.f32 %v2156_v63, %v3148_v62 }
 0x113   : > { %2177 = vrsqrt.f32 %v3252_v60  ;;  %v933_v36 = vsel %vm932_vm4, %v3083_v2, %v931_v23  ;;  %vm934_vm13 = vcmp.eq.f32.partialorder %v3083_v2, 0.0  ;;  %v2164_v59 = vpop.eup %2163  ;;  %v940_v43 = vsel %vm939_vm6, %v3075_v25, %v3259_v1  ;;  %v3382_v23 = vpop.xlane.xlu1 %530 }
 0x114   : > { %v1910_v27 = vpack.c.bf16 %v1313_v28, %v1312_v29  ;;  %v3347_v18 = vsel %vm934_vm13, %v935_v33, %v933_v36  ;;  %vm941_vm14 = vcmp.eq.f32.partialorder %v3075_v25, 0.0  ;;  %2179 = vrsqrt.f32 %v3262_v39  ;;  %v2294_v25 = vld [vmem:[%s4120_s1 + $0x130] sm:$0xff]  ;;  %v2297_v29 = vld [vmem:[%s4120_s1 + $0xc8] sm:$0xff] }
 0x115   : > { %v2166_v40 = vpop.eup %2165  ;;  %vm1024_vm15 = vcmp.gt.f32.partialorder %v3266_v48, 1.0  ;;  %v3358_v11 = vsel %vm941_vm14, %v942_v24, %v940_v43  ;;  %v1106_v2 = vadd.f32 1e-07, %v3347_v18  ;;  %vm820_vm1 = vcmp.eq.f32.partialorder %v3148_v62, inf }
 0x116   : > { %v2168_v33 = vpop.eup %2167  ;;  %1911 = vmatpush3.bf16.msra.mxu0 %v1910_v27  ;;  %2181 = vrsqrt.f32 %v3294_v9  ;;  %vm1025_vm2 = vcmp.gt.f32.partialorder %v3273_v45, 1.0  ;;  %v1280_v1 = vsel %vm1024_vm15, %v2166_v40, 1.0  ;;  %v1107_v10 = vadd.f32 1e-07, %v3358_v11  ;;  %v2295_v45 = vld [vmem:[%s4120_s1 + $0x138] sm:$0xff] }
 0x117   : > { %v3366_v37 = vmul.f32 %v2162_v17, %v3174_v31  ;;  %v1281_v48 = vsel %vm1025_vm2, %v2168_v33, 1.0  ;;  %v1344_v24 = vmul.f32 %v2294_v25, %v1280_v1  ;;  %2183 = vrcp.f32 %v1106_v2  ;;  %v3423_v36 = vpop.xlane.xlu1 %386  ;;  %v3434_v2 = vpop.xlane.xlu0 %383 }
 0x118   : > { %vm827_vm3 = vcmp.eq.f32.partialorder %v3139_v13, inf  ;;  %v956_v34 = vand.u32 2147483648, %v3210_v58  ;;  %v949_v49 = vand.u32 2147483648, %v3219_v52  ;;  %v1345_v42 = vmul.f32 %v2295_v45, %v1281_v48  ;;  %v2170_v5 = vpop.eup %2169 }
 0x119   : > { %2185 = vrcp.f32 %v1107_v10  ;;  %v3378_v53 = vmul.f32 %v2164_v59, %v3183_v35  ;;  %v620_v21 = vand.u32 2147483648, %v3252_v60  ;;  %v597_v4 = vsel %vm596_vm10, %v3116_v47, %v595_v55  ;;  %v2172_v63 = vpop.eup %2171 }
 0x11a   : > { %2187 = vrsqrt.f32 %v3303_v12  ;;  %v1942_v19 = vpack.c.bf16 %v1345_v42, %v1344_v24  ;;  %vm598_vm4 = vcmp.eq.f32.partialorder %v3116_v47, 0.0  ;;  %v604_v7 = vsel %vm603_vm12, %v3108_v38, %v3301_v22  ;;  %v2296_v47 = vld [vmem:[%s4120_s1 + $0xc0] sm:$0xff] }
 0x11b   : > { %vm605_vm5 = vcmp.eq.f32.partialorder %v3108_v38, 0.0  ;;  %v2174_v3 = vpop.eup %2173  ;;  %2189 = vrsqrt.f32 %v3337_v30  ;;  %vm1010_vm6 = vcmp.gt.f32.partialorder %v3307_v14, 1.0  ;;  %v3399_v54 = vsel %vm598_vm4, %v599_v41, %v597_v4 }
 0x11c   : > { %v3403_v44 = vsel %vm605_vm5, %v606_v32, %v604_v7  ;;  %v2176_v55 = vpop.eup %2175  ;;  %vm722_vm7 = vcmp.eq.f32.partialorder %v3183_v35, inf  ;;  %1943 = vmatpush3.bf16.msra.mxu1 %v1942_v19  ;;  %2191 = vrsqrt.f32 %v3343_v0  ;;  %vm1011_vm8 = vcmp.gt.f32.partialorder %v3314_v20, 1.0  ;;  %v3471_v19 = vpop.xlane.xlu1 %482 }
 0x11d   : > { %v1266_v22 = vsel %vm1010_vm6, %v2174_v3, 1.0  ;;  %v1058_v57 = vadd.f32 1e-07, %v3399_v54  ;;  %v2178_v14 = vpop.eup %2177  ;;  %v1267_v56 = vsel %vm1011_vm8, %v2176_v55, 1.0  ;;  %2193 = vrsqrt.f32 %v3382_v23 }
 0x11e   : > { %v1330_v38 = vmul.f32 %v2296_v47, %v1266_v22  ;;  %v1059_v32 = vadd.f32 1e-07, %v3403_v44  ;;  %vm729_vm9 = vcmp.eq.f32.partialorder %v3174_v31, inf  ;;  %v3416_v41 = vmul.f32 %v2170_v5, %v3210_v58  ;;  %v2180_v28 = vpop.eup %2179 }
 0x11f   : > { %v613_v20 = vand.u32 2147483648, %v3262_v39  ;;  %v1331_v15 = vmul.f32 %v2297_v29, %v1267_v56  ;;  %2195 = vrcp.f32 %v1058_v57  ;;  %v844_v17 = vand.u32 2147483648, %v3294_v9 }
 0x120   : > { %2197 = vrcp.f32 %v1059_v32  ;;  %v821_v59 = vsel %vm820_vm1, %v3148_v62, %v3334_v26  ;;  %vm822_vm10 = vcmp.eq.f32.partialorder %v3148_v62, 0.0  ;;  %v2182_v27 = vpop.eup %2181  ;;  %v3431_v43 = vmul.f32 %v2172_v63, %v3219_v52 }
 0x121   : > { %v1912_v40 = vpack.c.bf16 %v1331_v15, %v1330_v38  ;;  %2199 = vrsqrt.f32 %v3387_v51  ;;  %v3438_v33 = vsel %vm822_vm10, %v823_v50, %v821_v59  ;;  %v2184_v1 = vpop.eup %2183  ;;  %vm1042_vm11 = vcmp.gt.f32.partialorder %v3347_v18, 1.0  ;;  %v2298_v18 = vld [vmem:[%s4120_s1 + $0x1c0] sm:$0xff]  ;;  %v3504_v15 = vpop.xlane.xlu0 %479 }
 0x122   : > { %v828_v26 = vsel %vm827_vm3, %v3139_v13, %v3327_v16  ;;  %vm829_vm12 = vcmp.eq.f32.partialorder %v3139_v13, 0.0  ;;  %v1090_v10 = vadd.f32 1e-07, %v3438_v33  ;;  %vm1043_vm13 = vcmp.gt.f32.partialorder %v3358_v11, 1.0 }
 0x123   : > { %v2186_v48 = vpop.eup %2185  ;;  %1913 = vmatprep.subr.bf16.mxu0 %v1912_v40  ;;  %v1298_v25 = vsel %vm1042_vm11, %v2184_v1, 1.0  ;;  %2201 = vrsqrt.f32 %v3423_v36  ;;  %v3451_v62 = vsel %vm829_vm12, %v830_v6, %v828_v26  ;;  %vm953_vm14 = vcmp.eq.f32.partialorder %v3210_v58, inf  ;;  %v2299_v6 = vld [vmem:[%s4120_s1 + $0x1c8] sm:$0xff] }
 0x124   : > { %v2188_v50 = vpop.eup %2187  ;;  %vm946_vm15 = vcmp.eq.f32.partialorder %v3219_v52, inf  ;;  %v1299_v16 = vsel %vm1043_vm13, %v2186_v48, 1.0  ;;  %v1362_v24 = vmul.f32 %v2298_v18, %v1298_v25  ;;  %2203 = vrsqrt.f32 %v3434_v2  ;;  %v2301_v1 = vld [vmem:[%s4120_s1 + $0x48] sm:$0xff] }
 0x125   : > { %v1091_v11 = vadd.f32 1e-07, %v3451_v62  ;;  %v3461_v45 = vmul.f32 %v2178_v14, %v3252_v60  ;;  %v837_v13 = vand.u32 2147483648, %v3303_v12  ;;  %v1363_v42 = vmul.f32 %v2299_v6, %v1299_v16  ;;  %v2190_v5 = vpop.eup %2189 }
 0x126   : > { %2205 = vrcp.f32 %v1090_v10  ;;  %v3468_v4 = vmul.f32 %v2180_v28, %v3262_v39  ;;  %v746_v63 = vand.u32 2147483648, %v3337_v30  ;;  %v723_v7 = vsel %vm722_vm7, %v3183_v35, %v3378_v53  ;;  %v2192_v3 = vpop.eup %2191  ;;  %v3519_v10 = vpop.xlane.xlu1 %440 }
 0x127   : > { %2207 = vrcp.f32 %v1091_v11  ;;  %v3478_v55 = vmul.f32 %v2182_v27, %v3294_v9  ;;  %v739_v22 = vand.u32 2147483648, %v3343_v0  ;;  %v1944_v57 = vpack.c.bf16 %v1363_v42, %v1362_v24  ;;  %v2194_v14 = vpop.eup %2193 }
 0x128   : > { %vm724_vm1 = vcmp.eq.f32.partialorder %v3183_v35, 0.0  ;;  %v970_v56 = vand.u32 2147483648, %v3382_v23  ;;  %v730_v53 = vsel %vm729_vm9, %v3174_v31, %v3366_v37  ;;  %vm731_vm2 = vcmp.eq.f32.partialorder %v3174_v31, 0.0 }
 0x129   : > { %v3485_v47 = vsel %vm724_vm1, %v725_v46, %v723_v7  ;;  %v2196_v38 = vpop.eup %2195  ;;  %v3493_v32 = vmul.f32 %v2188_v50, %v3303_v12  ;;  %1945 = vmatprep.subr.bf16.mxu1 %v1944_v57  ;;  %vm994_vm3 = vcmp.gt.f32.partialorder %v3399_v54, 1.0  ;;  %v3498_v29 = vsel %vm731_vm2, %v732_v8, %v730_v53  ;;  %v2300_v54 = vld [vmem:[%s4120_s1 + $0x40] sm:$0xff]  ;;  %v2303_v53 = vld [vmem:[%s4120_s1 + $0x148] sm:$0xff] }
 0x12a   : > { %v1076_v35 = vadd.f32 1e-07, %v3485_v47  ;;  %v2198_v46 = vpop.eup %2197  ;;  %vm610_vm4 = vcmp.eq.f32.partialorder %v3262_v39, inf  ;;  %vm995_vm5 = vcmp.gt.f32.partialorder %v3403_v44, 1.0  ;;  %v1250_v37 = vsel %vm994_vm3, %v2196_v38, 1.0 }
 0x12b   : > { %2209 = vrsqrt.f32 %v3471_v19  ;;  %v1077_v28 = vadd.f32 1e-07, %v3498_v29  ;;  %v2200_v59 = vpop.eup %2199  ;;  %vm617_vm6 = vcmp.eq.f32.partialorder %v3252_v60, inf  ;;  %v963_v31 = vand.u32 2147483648, %v3387_v51 }
 0x12c   : > { %v1251_v8 = vsel %vm995_vm5, %v2198_v46, 1.0  ;;  %v1314_v27 = vmul.f32 %v2300_v54, %v1250_v37  ;;  %2211 = vrcp.f32 %v1076_v35  ;;  %v3513_v44 = vmul.f32 %v2190_v5, %v3337_v30  ;;  %v3566_v35 = vpop.xlane.xlu1 %536 }
 0x12d   : > { %v634_v40 = vand.u32 2147483648, %v3423_v36  ;;  %v1315_v26 = vmul.f32 %v2301_v1, %v1251_v8  ;;  %2213 = vrcp.f32 %v1077_v28  ;;  %v2202_v48 = vpop.eup %2201  ;;  %v3522_v25 = vmul.f32 %v2192_v3, %v3343_v0 }
 0x12e   : > { %v947_v50 = vsel %vm946_vm15, %v3219_v52, %v3431_v43  ;;  %vm948_vm7 = vcmp.eq.f32.partialorder %v3219_v52, 0.0  ;;  %v954_v16 = vsel %vm953_vm14, %v3210_v58, %v3416_v41  ;;  %v2204_v18 = vpop.eup %2203  ;;  %v3534_v24 = vmul.f32 %v2194_v14, %v3382_v23 }
 0x12f   : > { %v1914_v11 = vpack.c.bf16 %v1315_v26, %v1314_v27  ;;  %v3538_v6 = vsel %vm948_vm7, %v949_v49, %v947_v50  ;;  %vm955_vm8 = vcmp.eq.f32.partialorder %v3210_v58, 0.0  ;;  %v627_v43 = vand.u32 2147483648, %v3434_v2  ;;  %v3551_v49 = vpop.xlane.xlu0 %437 }
 0x130   : > { %v2206_v42 = vpop.eup %2205  ;;  %vm1026_vm9 = vcmp.gt.f32.partialorder %v3438_v33, 1.0  ;;  %v3545_v5 = vsel %vm955_vm8, %v956_v34, %v954_v16  ;;  %v1108_v41 = vadd.f32 1e-07, %v3538_v6  ;;  %vm834_vm10 = vcmp.eq.f32.partialorder %v3303_v12, inf  ;;  %v2302_v34 = vld [vmem:[%s4120_s1 + $0x140] sm:$0xff] }
 0x131   : > { %v2208_v7 = vpop.eup %2207  ;;  %1915 = vmatpush3.bf16.msra.mxu0 %v1914_v11  ;;  %2215 = vrsqrt.f32 %v3504_v15  ;;  %vm1027_vm11 = vcmp.gt.f32.partialorder %v3451_v62, 1.0  ;;  %v1282_v52 = vsel %vm1026_vm9, %v2206_v42, 1.0  ;;  %v1109_v3 = vadd.f32 1e-07, %v3545_v5  ;;  %v3615_v42 = vpop.xlane.xlu1 %392 }
 0x132   : > { %v858_v33 = vand.u32 2147483648, %v3471_v19  ;;  %v1283_v58 = vsel %vm1027_vm11, %v2208_v7, 1.0  ;;  %v1346_v57 = vmul.f32 %v2302_v34, %v1282_v52  ;;  %2217 = vrcp.f32 %v1108_v41 }
 0x133   : > { %vm841_vm12 = vcmp.eq.f32.partialorder %v3294_v9, inf  ;;  %v3560_v14 = vmul.f32 %v2200_v59, %v3387_v51  ;;  %v851_v62 = vand.u32 2147483648, %v3504_v15  ;;  %v1347_v38 = vmul.f32 %v2303_v53, %v1283_v58  ;;  %v3599_v50 = vpop.xlane.xlu0 %533 }
 0x134   : > { %2219 = vrcp.f32 %v1109_v3  ;;  %vm736_vm13 = vcmp.eq.f32.partialorder %v3343_v0, inf  ;;  %v3570_v46 = vmul.f32 %v2202_v48, %v3423_v36  ;;  %v3573_v37 = vmul.f32 %v2204_v18, %v3434_v2  ;;  %v2305_v18 = vld [vmem:[%s4120_s1 + $0xd8] sm:$0xff] }
 0x135   : > { %2221 = vrsqrt.f32 %v3519_v10  ;;  %v611_v28 = vsel %vm610_vm4, %v3262_v39, %v3468_v4  ;;  %v2210_v59 = vpop.eup %2209  ;;  %v1946_v8 = vpack.c.bf16 %v1347_v38, %v1346_v57  ;;  %vm612_vm14 = vcmp.eq.f32.partialorder %v3262_v39, 0.0 }
 0x136   : > { %v618_v54 = vsel %vm617_vm6, %v3252_v60, %v3461_v45  ;;  %vm619_vm15 = vcmp.eq.f32.partialorder %v3252_v60, 0.0  ;;  %v2212_v27 = vpop.eup %2211  ;;  %v760_v1 = vand.u32 2147483648, %v3519_v10  ;;  %vm1012_vm1 = vcmp.gt.f32.partialorder %v3485_v47, 1.0  ;;  %v2304_v60 = vld [vmem:[%s4120_s1 + $0xd0] sm:$0xff] }
 0x137   : > { %v3590_v26 = vsel %vm612_vm14, %v613_v20, %v611_v28  ;;  %v3594_v4 = vsel %vm619_vm15, %v620_v21, %v618_v54  ;;  %v2214_v48 = vpop.eup %2213  ;;  %vm743_vm2 = vcmp.eq.f32.partialorder %v3337_v30, inf  ;;  %1947 = vmatpush3.bf16.msra.mxu1 %v1946_v8  ;;  %2223 = vrsqrt.f32 %v3551_v49 }
 0x138   : > { %vm1013_vm3 = vcmp.gt.f32.partialorder %v3498_v29, 1.0  ;;  %v1268_v45 = vsel %vm1012_vm1, %v2212_v27, 1.0  ;;  %v1060_v47 = vadd.f32 1e-07, %v3590_v26  ;;  %2225 = vrsqrt.f32 %v3566_v35 }
 0x139   : > { %v1269_v39 = vsel %vm1013_vm3, %v2214_v48, 1.0  ;;  %v1332_v21 = vmul.f32 %v2304_v60, %v1268_v45  ;;  %v1061_v20 = vadd.f32 1e-07, %v3594_v4  ;;  %vm960_vm4 = vcmp.eq.f32.partialorder %v3387_v51, inf }
 0x13a   : > { %v3609_v16 = vmul.f32 %v2210_v59, %v3471_v19  ;;  %v753_v29 = vand.u32 2147483648, %v3551_v49  ;;  %v1333_v11 = vmul.f32 %v2305_v18, %v1269_v39  ;;  %2227 = vrcp.f32 %v1060_v47 }
 0x13b   : > { %vm967_vm5 = vcmp.eq.f32.partialorder %v3382_v23, inf  ;;  %v984_v41 = vand.u32 2147483648, %v3566_v35  ;;  %2229 = vrcp.f32 %v1061_v20  ;;  %v835_v7 = vsel %vm834_vm10, %v3303_v12, %v3493_v32  ;;  %v2216_v52 = vpop.eup %2215 }
 0x13c   : > { %vm836_vm6 = vcmp.eq.f32.partialorder %v3303_v12, 0.0  ;;  %v1916_v3 = vpack.c.bf16 %v1333_v11, %v1332_v21  ;;  %2231 = vrsqrt.f32 %v3599_v50  ;;  %vm1044_vm7 = vcmp.gt.f32.partialorder %v3538_v6, 1.0  ;;  %v2218_v34 = vpop.eup %2217 }
 0x13d   : > { %v3628_v58 = vsel %vm836_vm6, %v837_v13, %v835_v7  ;;  %2233 = vrsqrt.f32 %v3615_v42  ;;  %v842_v32 = vsel %vm841_vm12, %v3294_v9, %v3478_v55  ;;  %vm843_vm8 = vcmp.eq.f32.partialorder %v3294_v9, 0.0  ;;  %v3639_v13 = vpop.xlane.xlu0 %389 }
 0x13e   : > { %v1092_v57 = vadd.f32 1e-07, %v3628_v58  ;;  %v2220_v53 = vpop.eup %2219  ;;  %vm624_vm9 = vcmp.eq.f32.partialorder %v3434_v2, inf  ;;  %1917 = vmatprep.subr.bf16.mxu0 %v1916_v3  ;;  %vm1045_vm10 = vcmp.gt.f32.partialorder %v3545_v5, 1.0  ;;  %v1300_v12 = vsel %vm1044_vm7, %v2218_v34, 1.0  ;;  %v2306_v5 = vld [vmem:[%s4120_s1 + $0x1d0] sm:$0xff] }
 0x13f   : > { %v3643_v6 = vsel %vm843_vm8, %v844_v17, %v842_v32  ;;  %v737_v55 = vsel %vm736_vm13, %v3343_v0, %v3522_v25  ;;  %v2222_v38 = vpop.eup %2221  ;;  %vm631_vm11 = vcmp.eq.f32.partialorder %v3423_v36, inf  ;;  %v1301_v28 = vsel %vm1045_vm10, %v2220_v53, 1.0  ;;  %v2307_v17 = vld [vmem:[%s4120_s1 + $0x1d8] sm:$0xff] }
 0x140   : > { %v1364_v59 = vmul.f32 %v2306_v5, %v1300_v12  ;;  %v1093_v8 = vadd.f32 1e-07, %v3643_v6  ;;  %vm738_vm12 = vcmp.eq.f32.partialorder %v3343_v0, 0.0  ;;  %v3656_v9 = vmul.f32 %v2216_v52, %v3504_v15 }
 0x141   : > { %v1365_v25 = vmul.f32 %v2307_v17, %v1301_v28  ;;  %2235 = vrcp.f32 %v1092_v57  ;;  %v3663_v54 = vsel %vm738_vm12, %v739_v22, %v737_v55  ;;  %v977_v27 = vand.u32 2147483648, %v3599_v50  ;;  %v3671_v45 = vpop.eup %2223 }
 0x142   : > { %2237 = vrcp.f32 %v1093_v8  ;;  %v744_v48 = vsel %vm743_vm2, %v3337_v30, %v3513_v44  ;;  %vm745_vm13 = vcmp.eq.f32.partialorder %v3337_v30, 0.0  ;;  %vm848_vm14 = vcmp.eq.f32.partialorder %v3504_v15, inf  ;;  %v3680_v39 = vpop.eup %2225  ;;  %v3683_v44 = vpop.xlane.xlu1 %488  ;;  %v2311_v8 = vld [vmem:[%s4120_s1 + $0x158] sm:$0xff] }
 0x143   : > { %v1948_v47 = vpack.c.bf16 %v1365_v25, %v1364_v59  ;;  %2239 = vrsqrt.f32 %v3639_v13  ;;  %v3677_v0 = vsel %vm745_vm13, %v746_v63, %v744_v48  ;;  %v1078_v22 = vadd.f32 1e-07, %v3663_v54  ;;  %v3691_v63 = vpop.xlane.xlu0 %485 }
 0x144   : > { %vm996_vm15 = vcmp.gt.f32.partialorder %v3590_v26, 1.0  ;;  %v1079_v60 = vadd.f32 1e-07, %v3677_v0  ;;  %v961_v21 = vsel %vm960_vm4, %v3387_v51, %v3560_v14  ;;  %vm962_vm1 = vcmp.eq.f32.partialorder %v3387_v51, 0.0  ;;  %v2228_v30 = vpop.eup %2227 }
 0x145   : > { %1949 = vmatprep.subr.bf16.mxu1 %v1948_v47  ;;  %2241 = vrcp.f32 %v1078_v22  ;;  %v3695_v20 = vsel %vm962_vm1, %v963_v31, %v961_v21  ;;  %v968_v26 = vsel %vm967_vm5, %v3382_v23, %v3534_v24  ;;  %vm969_vm2 = vcmp.eq.f32.partialorder %v3382_v23, 0.0  ;;  %v2230_v18 = vpop.eup %2229  ;;  %v2308_v24 = vld [vmem:[%s4120_s1 + $0x50] sm:$0xff]  ;;  %v2309_v23 = vld [vmem:[%s4120_s1 + $0x58] sm:$0xff] }
 0x146   : > { %vm855_vm3 = vcmp.eq.f32.partialorder %v3471_v19, inf  ;;  %vm997_vm4 = vcmp.gt.f32.partialorder %v3594_v4, 1.0  ;;  %v1252_v14 = vsel %vm996_vm15, %v2228_v30, 1.0  ;;  %2243 = vrcp.f32 %v1079_v60  ;;  %v3708_v51 = vpop.eup %2231 }
 0x147   : > { %v3706_v11 = vsel %vm969_vm2, %v970_v56, %v968_v26  ;;  %v1253_v31 = vsel %vm997_vm4, %v2230_v18, 1.0  ;;  %v1316_v7 = vmul.f32 %v2308_v24, %v1252_v14  ;;  %2245 = vrsqrt.f32 %v3683_v44  ;;  %v3715_v3 = vpop.eup %2233  ;;  %v3792_v24 = vpop.permute.xlu1 %1396 }
 0x148   : > { %v1110_v52 = vadd.f32 1e-07, %v3695_v20  ;;  %v1317_v56 = vmul.f32 %v2309_v23, %v1253_v31  ;;  %2247 = vrsqrt.f32 %v3691_v63  ;;  %v1111_v4 = vadd.f32 1e-07, %v3706_v11 }
 0x149   : > { %v625_v34 = vsel %vm624_vm9, %v3434_v2, %v3573_v37  ;;  %vm626_vm5 = vcmp.eq.f32.partialorder %v3434_v2, 0.0  ;;  %v632_v32 = vsel %vm631_vm11, %v3423_v36, %v3570_v46  ;;  %vm633_vm6 = vcmp.eq.f32.partialorder %v3423_v36, 0.0 }
 0x14a   : > { %2249 = vrcp.f32 %v1110_v52  ;;  %v1918_v57 = vpack.c.bf16 %v1317_v56, %v1316_v7  ;;  %v3734_v53 = vsel %vm626_vm5, %v627_v43, %v625_v34  ;;  %v3738_v12 = vsel %vm633_vm6, %v634_v40, %v632_v32 }
 0x14b   : > { %2251 = vrcp.f32 %v1111_v4  ;;  %v2236_v37 = vpop.eup %2235  ;;  %v3741_v55 = vmul.f32 %v2222_v38, %v3519_v10  ;;  %vm1028_vm7 = vcmp.gt.f32.partialorder %v3628_v58, 1.0  ;;  %v1062_v46 = vadd.f32 1e-07, %v3734_v53  ;;  %v2310_v58 = vld [vmem:[%s4120_s1 + $0x150] sm:$0xff] }
 0x14c   : > { %v1063_v28 = vadd.f32 1e-07, %v3738_v12  ;;  %v2238_v5 = vpop.eup %2237  ;;  %1919 = vmatpush3.bf16.msra.mxu0 %v1918_v57  ;;  %vm1029_vm8 = vcmp.gt.f32.partialorder %v3643_v6, 1.0  ;;  %v1284_v2 = vsel %vm1028_vm7, %v2236_v37, 1.0  ;;  %v849_v36 = vsel %vm848_vm14, %v3504_v15, %v3656_v9 }
 0x14d   : > { %vm850_vm9 = vcmp.eq.f32.partialorder %v3504_v15, 0.0  ;;  %v2240_v40 = vpop.eup %2239  ;;  %v1285_v43 = vsel %vm1029_vm8, %v2238_v5, 1.0  ;;  %v1348_v38 = vmul.f32 %v2310_v58, %v1284_v2  ;;  %2253 = vrcp.f32 %v1062_v46 }
 0x14e   : > { %v3757_v59 = vsel %vm850_vm9, %v851_v62, %v849_v36  ;;  %v648_v6 = vand.u32 2147483648, %v3615_v42  ;;  %v1349_v9 = vmul.f32 %v2311_v8, %v1285_v43  ;;  %2255 = vrcp.f32 %v1063_v28 }
 0x14f   : > { %v1371_v17 = vlaneseq  ;;  %v2242_v25 = vpop.eup %2241  ;;  %v3765_v48 = vmul.f32 %v3671_v45, %v3551_v49  ;;  %vm1014_vm10 = vcmp.gt.f32.partialorder %v3663_v54, 1.0  ;;  %v856_v15 = vsel %vm855_vm3, %v3471_v19, %v3609_v16  ;;  %v2312_v16 = vld [vmem:[%s4120_s1 + $0xe0] sm:$0xff] }
 0x150   : > { %v1094_v62 = vadd.f32 1e-07, %v3757_v59  ;;  %v2244_v47 = vpop.eup %2243  ;;  %v3775_v22 = vmul.f32 %v3680_v39, %v3566_v35  ;;  %v1950_v60 = vpack.c.bf16 %v1349_v9, %v1348_v38  ;;  %vm1015_vm11 = vcmp.gt.f32.partialorder %v3677_v0, 1.0  ;;  %v2313_v0 = vld [vmem:[%s4120_s1 + $0xe8] sm:$0xff]  ;;  %v3836_v38 = vpop.permute.xlu1 %1415  ;;  %v2316_v9 = vld [vmem:[%s4120_s1 + $0x60] sm:$0xff] }
 0x151   : > { %v1270_v21 = vsel %vm1014_vm10, %v2242_v25, 1.0  ;;  %v2246_v45 = vpop.eup %2245  ;;  %vm750_vm12 = vcmp.eq.f32.partialorder %v3551_v49, inf  ;;  %v641_v54 = vand.u32 2147483648, %v3639_v13  ;;  %v1271_v30 = vsel %vm1015_vm11, %v2244_v47, 1.0  ;;  %v2317_v25 = vld [vmem:[%s4120_s1 + $0x68] sm:$0xff] }
 0x152   : > { %v1334_v26 = vmul.f32 %v2312_v16, %v1270_v21  ;;  %vm857_vm13 = vcmp.eq.f32.partialorder %v3471_v19, 0.0  ;;  %v2248_v18 = vpop.eup %2247  ;;  %vm757_vm14 = vcmp.eq.f32.partialorder %v3519_v10, inf  ;;  %v872_v39 = vand.u32 2147483648, %v3683_v44  ;;  %1951 = vmatpush3.bf16.msra.mxu1 %v1950_v60 }
 0x153   : > { %v1335_v14 = vmul.f32 %v2313_v0, %v1271_v30  ;;  %v3790_v31 = vand.u32 127, %v1371_v17  ;;  %v3796_v7 = vsel %vm857_vm13, %v858_v33, %v856_v15  ;;  %v3800_v23 = vmul.f32 %v3708_v51, %v3599_v50 }
 0x154   : > { %v2250_v52 = vpop.eup %2249  ;;  %vm1046_vm15 = vcmp.gt.f32.partialorder %v3695_v20, 1.0  ;;  %v1095_v56 = vadd.f32 1e-07, %v3796_v7  ;;  %2257 = vrcp.f32 %v1094_v62  ;;  %v865_v34 = vand.u32 2147483648, %v3691_v63  ;;  %v2314_v20 = vld [vmem:[%s4120_s1 + $0x1e0] sm:$0xff]  ;;  %v3855_v62 = vpop.permute.xlu0 %1377 }
 0x155   : > { %v2252_v4 = vpop.eup %2251  ;;  %v1920_v32 = vpack.c.bf16 %v1335_v14, %v1334_v26  ;;  %vm1047_vm1 = vcmp.gt.f32.partialorder %v3706_v11, 1.0  ;;  %v1302_v57 = vsel %vm1046_vm15, %v2250_v52, 1.0  ;;  %vm974_vm2 = vcmp.eq.f32.partialorder %v3599_v50, inf }
 0x156   : > { %v3809_v19 = vmul.f32 %v3715_v3, %v3615_v42  ;;  %v1303_v33 = vsel %vm1047_vm1, %v2252_v4, 1.0  ;;  %v1366_v51 = vmul.f32 %v2314_v20, %v1302_v57  ;;  %2259 = vrcp.f32 %v1095_v56  ;;  %v2315_v3 = vld [vmem:[%s4120_s1 + $0x1e8] sm:$0xff] }
 0x157   : > { %vm981_vm3 = vcmp.eq.f32.partialorder %v3566_v35, inf  ;;  %v3816_v37 = vmul.f32 %v2240_v40, %v3639_v13  ;;  %v3819_v11 = vmul.f32 %v2246_v45, %v3683_v44  ;;  %1921 = vmatprep.subr.bf16.mxu0 %v1920_v32  ;;  %v1367_v46 = vmul.f32 %v2315_v3, %v1303_v33  ;;  %v2254_v5 = vpop.eup %2253  ;;  %v2319_v56 = vld [vmem:[%s4120_s1 + $0x168] sm:$0xff]  ;;  %v3933_v32 = vpop.permute.xlu1 %1434 }
 0x158   : > { %v3825_v28 = vadd.s32 128, %v3790_v31  ;;  %v3828_v2 = vmul.f32 %v2248_v18, %v3691_v63  ;;  %vm998_vm4 = vcmp.gt.f32.partialorder %v3734_v53, 1.0  ;;  %vm999_vm5 = vcmp.gt.f32.partialorder %v3738_v12, 1.0  ;;  %v2256_v36 = vpop.eup %2255 }
 0x159   : > { %vm1030_vm6 = vcmp.gt.f32.partialorder %v3757_v59, 1.0  ;;  %v1952_v40 = vpack.c.bf16 %v1367_v46, %v1366_v51  ;;  %v1254_v43 = vsel %vm998_vm4, %v2254_v5, 1.0  ;;  %v3834_v58 = vadd.s32 384, %v3790_v31 }
 0x15a   : > { %vm638_vm7 = vcmp.eq.f32.partialorder %v3639_v13, inf  ;;  %v1255_v8 = vsel %vm999_vm5, %v2256_v36, 1.0  ;;  %v1318_v53 = vmul.f32 %v2316_v9, %v1254_v43  ;;  %v3843_v12 = vadd.s32 256, %v3790_v31 }
 0x15b   : > { %vm1417_vm8 = vcmp.eq.s32.totalorder %v3790_v31, %v3836_v38  ;;  %vm645_vm9 = vcmp.eq.f32.partialorder %v3615_v42, inf  ;;  %1953 = vmatprep.subr.bf16.mxu1 %v1952_v40  ;;  %v1319_v15 = vmul.f32 %v2317_v25, %v1255_v8  ;;  %vm1398_vm10 = vcmp.eq.s32.totalorder %v3790_v31, %v3792_v24 }
 0x15c   : > { %vm1399_vm11 = vcmp.eq.s32.totalorder %v3825_v28, %v3792_v24  ;;  %v751_v47 = vsel %vm750_vm12, %v3551_v49, %v3765_v48  ;;  %vm1031_vm13 = vcmp.gt.f32.partialorder %v3796_v7, 1.0  ;;  %vm752_vm15 = vcmp.eq.f32.partialorder %v3551_v49, 0.0 }
 0x15d   : > { %v758_v60 = vsel %vm757_vm14, %v3519_v10, %v3741_v55  ;;  %vm759_vm1 = vcmp.eq.f32.partialorder %v3519_v10, 0.0  ;;  %v1922_v21 = vpack.c.bf16 %v1319_v15, %v1318_v53  ;;  %vm1401_vm4 = vcmp.eq.s32.totalorder %v3834_v58, %v3792_v24 }
 0x15e   : > { %v2396_v45 = vmov 0.0   ;;  %v3878_v30 = vsel %vm752_vm15, %v753_v29, %v751_v47  ;;  %v3882_v55 = vsel %vm759_vm1, %v760_v1, %v758_v60  ;;  %v2258_v16 = vpop.eup %2257  ;;  %vm1379_vm12 = vcmp.eq.s32.totalorder %v3790_v31, %v3855_v62  ;;  %v2318_v29 = vld [vmem:[%s4120_s1 + $0x160] sm:$0xff] }
 0x15f   : > { %v3874_v48 = vsel %vm1417_vm8, 1.0, %v2396_v45  ;;  %v3885_v26 = vsel %vm1398_vm10, 1.0, %v2396_v45  ;;  %v1080_v18 = vadd.f32 1e-07, %v3878_v30  ;;  %v1081_v0 = vadd.f32 1e-07, %v3882_v55  ;;  %1923 = vmatpush3.bf16.msra.mxu0 %v1922_v21 }
 0x160   : > { %v1286_v49 = vsel %vm1030_vm6, %v2258_v16, 1.0  ;;  %vm1380_vm14 = vcmp.eq.s32.totalorder %v3825_v28, %v3855_v62  ;;  %vm1382_vm5 = vcmp.eq.s32.totalorder %v3834_v58, %v3855_v62  ;;  %v975_v10 = vsel %vm974_vm2, %v3599_v50, %v3800_v23  ;;  %v2260_v1 = vpop.eup %2259 }
 0x161   : > { %v1350_v14 = vmul.f32 %v2318_v29, %v1286_v49  ;;  %2261 = vrcp.f32 %v1080_v18  ;;  %vm976_vm6 = vcmp.eq.f32.partialorder %v3599_v50, 0.0  ;;  %v982_v59 = vsel %vm981_vm3, %v3566_v35, %v3775_v22 }
 0x162   : > { %vm862_vm8 = vcmp.eq.f32.partialorder %v3691_v63, inf  ;;  %v1287_v52 = vsel %vm1031_vm13, %v2260_v1, 1.0  ;;  %2263 = vrcp.f32 %v1081_v0  ;;  %v3914_v23 = vsel %vm976_vm6, %v977_v27, %v975_v10 }
 0x163   : > { %vm983_vm2 = vcmp.eq.f32.partialorder %v3566_v35, 0.0  ;;  %v1351_v4 = vmul.f32 %v2319_v56, %v1287_v52  ;;  %v1794_v22 = vsel %vm1379_vm12, 1.0, %v2396_v45  ;;  %v1112_v50 = vadd.f32 1e-07, %v3914_v23 }
 0x164   : > { %v3926_v7 = vsel %vm983_vm2, %v984_v41, %v982_v59  ;;  %v1795_v27 = vsel %vm1380_vm14, 1.0, %v2396_v45  ;;  %v639_v33 = vsel %vm638_vm7, %v3639_v13, %v3816_v37  ;;  %vm640_vm3 = vcmp.eq.f32.partialorder %v3639_v13, 0.0 }
 0x165   : > { %v1113_v57 = vadd.f32 1e-07, %v3926_v7  ;;  %vm869_vm10 = vcmp.eq.f32.partialorder %v3683_v44, inf  ;;  %v1954_v35 = vpack.c.bf16 %v1351_v4, %v1350_v14  ;;  %2265 = vrcp.f32 %v1112_v50  ;;  %v2322_v14 = vld [vmem:[%s4120_s1 + $0x1f0] sm:$0xff] }
 0x166   : > { %v3944_v41 = vsel %vm640_vm3, %v641_v54, %v639_v33  ;;  %v646_v20 = vsel %vm645_vm9, %v3615_v42, %v3809_v19  ;;  %v1797_v51 = vsel %vm1382_vm5, 1.0, %v2396_v45  ;;  %vm647_vm7 = vcmp.eq.f32.partialorder %v3615_v42, 0.0 }
 0x167   : > { %2267 = vrcp.f32 %v1113_v57  ;;  %v1064_v37 = vadd.f32 1e-07, %v3944_v41  ;;  %1955 = vmatpush3.bf16.msra.mxu1 %v1954_v35  ;;  %v3958_v13 = vsel %vm647_vm7, %v648_v6, %v646_v20  ;;  %v1799_v54 = vsel %vm1399_vm11, 1.0, %v2396_v45  ;;  %v2325_v35 = vld [vmem:[%s4120_s1 + $0x78] sm:$0xff] }
 0x168   : > { %vm1418_vm9 = vcmp.eq.s32.totalorder %v3825_v28, %v3836_v38  ;;  %vm1437_vm13 = vcmp.eq.s32.totalorder %v3825_v28, %v3933_v32  ;;  %vm1016_vm15 = vcmp.gt.f32.partialorder %v3878_v30, 1.0  ;;  %v1065_v19 = vadd.f32 1e-07, %v3958_v13  ;;  %v2321_v30 = vld [vmem:[%s4120_s1 + $0xf8] sm:$0xff] }
 0x169   : > { %2269 = vrcp.f32 %v1064_v37  ;;  %v1411_v3 = vadd.f32 %v1799_v54, %v1795_v27  ;;  %v1803_v42 = vsel %vm1418_vm9, 1.0, %v2396_v45  ;;  %v1807_v6 = vsel %vm1437_vm13, 1.0, %v2396_v45  ;;  %v2324_v27 = vld [vmem:[%s4120_s1 + $0x70] sm:$0xff] }
 0x16a   : > { %v1801_v46 = vsel %vm1401_vm4, 1.0, %v2396_v45  ;;  %vm1420_vm11 = vcmp.eq.s32.totalorder %v3834_v58, %v3836_v38  ;;  %vm1400_vm1 = vcmp.eq.s32.totalorder %v3843_v12, %v3792_v24  ;;  %2271 = vrcp.f32 %v1065_v19 }
 0x16b   : > { %v1430_v28 = vadd.f32 %v1803_v42, %v1411_v3  ;;  %v1413_v5 = vadd.f32 %v1801_v46, %v1797_v51  ;;  %v1805_v36 = vsel %vm1420_vm11, 1.0, %v2396_v45  ;;  %v2262_v40 = vpop.eup %2261  ;;  %vm1017_vm12 = vcmp.gt.f32.partialorder %v3882_v55, 1.0  ;;  %v2011_v51 = vld [vmem:[%s3244_s8 + $0x4] ss:$8 sps:$4 sm:$0xff]  }
 0x16c   : > { %vm1439_vm14 = vcmp.eq.s32.totalorder %v3834_v58, %v3933_v32  ;;  %v863_v43 = vsel %vm862_vm8, %v3691_v63, %v3828_v2  ;;  %vm864_vm4 = vcmp.eq.f32.partialorder %v3691_v63, 0.0  ;;  %v2264_v8 = vpop.eup %2263  ;;  %v1272_v9 = vsel %vm1016_vm15, %v2262_v40, 1.0  ;;  %v2320_v58 = vld [vmem:[%s4120_s1 + $0xf0] sm:$0xff] }
 0x16d   : > { %v1449_v53 = vadd.f32 %v1807_v6, %v1430_v28  ;;  %v1432_v25 = vadd.f32 %v1805_v36, %v1413_v5  ;;  %v1809_v15 = vsel %vm1439_vm14, 1.0, %v2396_v45  ;;  %v1410_v47 = vadd.f32 %v3885_v26, %v1794_v22 }
 0x16e   : > { %v1273_v60 = vsel %vm1017_vm12, %v2264_v8, 1.0  ;;  %v1336_v21 = vmul.f32 %v2320_v58, %v1272_v9  ;;  %v3998_v2 = vsel %vm864_vm4, %v865_v34, %v863_v43  ;;  %v870_v26 = vsel %vm869_vm10, %v3683_v44, %v3819_v11  ;;  %v2012_v43 = vld [vmem:[%s3244_s8 + $0x10] ss:$8 sps:$4 sm:$0xff]   ;;  %v2014_v8 = vld [vmem:[%s3244_s8 + $0x14] ss:$8 sps:$4 sm:$0xff]  }
 0x16f   : > { %v1337_v55 = vmul.f32 %v2321_v30, %v1273_v60  ;;  %v1453_v16 = vmul.f32 0.25, %v1449_v53  ;;  %v1451_v18 = vadd.f32 %v1809_v15, %v1432_v25  ;;  %v2266_v0 = vpop.eup %2265  ;;  %vm1048_vm5 = vcmp.gt.f32.partialorder %v3914_v23, 1.0  ;;  %v2015_v9 = vld [vmem:[%s3244_s8 + $0x20] ss:$8 sps:$4 sm:$0xff]   ;;  %v2017_v53 = vld [vmem:[%s3244_s8 + $0x24] ss:$8 sps:$4 sm:$0xff]  }
 0x170   : > { %vm1049_vm6 = vcmp.gt.f32.partialorder %v3926_v7, 1.0  ;;  %vm871_vm8 = vcmp.eq.f32.partialorder %v3683_v44, 0.0  ;;  %v1096_v63 = vadd.f32 1e-07, %v3998_v2  ;;  %v1304_v10 = vsel %vm1048_vm5, %v2266_v0, 1.0  ;;  %v2323_v44 = vld [vmem:[%s4120_s1 + $0x1f8] sm:$0xff] }
 0x171   : > { %v2268_v34 = vpop.eup %2267  ;;  %v1924_v49 = vpack.c.bf16 %v1337_v55, %v1336_v21  ;;  %1520 = vmatprep.mubr.f32.mxu0 %v1453_v16  ;;  %v1455_v1 = vmul.f32 0.25, %v1451_v18  ;;  %v873_v29 = vsel %vm871_vm8, %v872_v39, %v870_v26  ;;  %vm1436_vm2 = vcmp.eq.s32.totalorder %v3790_v31, %v3933_v32  ;;  %v2020_v25 = vld [vmem:[%s3244_s8 + $0x34] ss:$8 sps:$4 sm:$0xff]   ;;  %v1605_v26 = vld [vmem:[%s213_s7] sm:$0x3] }
 0x172   : > { %v1305_v11 = vsel %vm1049_vm6, %v2268_v34, 1.0  ;;  %v1368_v59 = vmul.f32 %v2322_v14, %v1304_v10  ;;  %v1097_v52 = vadd.f32 1e-07, %v873_v29  ;;  %vm1381_vm3 = vcmp.eq.s32.totalorder %v3843_v12, %v3855_v62  ;;  %v2009_v62 = vld [vmem:[%s3244_s8] ss:$8 sps:$4 sm:$0xff]  }
 0x173   : > { %v2270_v23 = vpop.eup %2269  ;;  %1925 = vmatprep.subr.bf16.mxu0 %v1924_v49  ;;  %v1369_v39 = vmul.f32 %v2323_v44, %v1305_v11  ;;  %vm1000_vm10 = vcmp.gt.f32.partialorder %v3944_v41, 1.0  ;;  %1590 = vmatprep.mubr.f32.mxu1 %v1455_v1  ;;  %2273 = vrcp.f32 %v1096_v63  ;;  %v1429_v4 = vadd.f32 %v3874_v48, %v1410_v47 }
 0x174   : > { %v1256_v56 = vsel %vm1000_vm10, %v2270_v23, 1.0  ;;  %2275 = vrcp.f32 %v1097_v52  ;;  %v2272_v22 = vpop.eup %2271  ;;  %v1806_v7 = vsel %vm1436_vm2, 1.0, %v2396_v45  ;;  %vm1001_vm7 = vcmp.gt.f32.partialorder %v3958_v13, 1.0 }
 0x175   : > { %v1956_v50 = vpack.c.bf16 %v1369_v39, %v1368_v59  ;;  %v1320_v57 = vmul.f32 %v2324_v27, %v1256_v56  ;;  %v1800_v48 = vsel %vm1400_vm1, 1.0, %v2396_v45  ;;  %v1796_v31 = vsel %vm1381_vm3, 1.0, %v2396_v45 }
 0x176   : > { %v1257_v33 = vsel %vm1001_vm7, %v2272_v22, 1.0  ;;  %vm1419_vm9 = vcmp.eq.s32.totalorder %v3843_v12, %v3836_v38  ;;  %v1448_v20 = vadd.f32 %v1806_v7, %v1429_v4  ;;  %v1412_v37 = vadd.f32 %v1800_v48, %v1796_v31 }
 0x177   : > { %1957 = vmatprep.subr.bf16.mxu1 %v1956_v50  ;;  %v1321_v41 = vmul.f32 %v2325_v35, %v1257_v33  ;;  %v1804_v13 = vsel %vm1419_vm9, 1.0, %v2396_v45  ;;  %vm1438_vm13 = vcmp.eq.s32.totalorder %v3843_v12, %v3933_v32  ;;  %vm1032_vm15 = vcmp.gt.f32.partialorder %v3998_v2, 1.0  ;;  %v2326_v12 = vld [vmem:[%s4120_s1 + $0x170] sm:$0xff] }
 0x178   : > { %v1452_v54 = vmul.f32 0.25, %v1448_v20  ;;  %v1431_v19 = vadd.f32 %v1804_v13, %v1412_v37  ;;  %v1808_v42 = vsel %vm1438_vm13, 1.0, %v2396_v45  ;;  %vm1033_vm11 = vcmp.gt.f32.partialorder %v873_v29, 1.0  ;;  %v2327_v45 = vld [vmem:[%s4120_s1 + $0x178] sm:$0xff] }
 0x179   : > { %v1926_v24 = vpack.c.bf16 %v1321_v41, %v1320_v57  ;;  %v1608_v16 = vshrl.u32 %v1371_v17, 7 }
 0x17a   : > { %v1450_v5 = vadd.f32 %v1808_v42, %v1431_v19 }
 0x17b   : > { %1927 = vmatpush3.bf16.msra.mxu0 %v1926_v24  ;;  %v1609_v18 = vsub.s32 0, %v1608_v16  ;;  %v1613_v0 = vsub.s32 1, %v1608_v16 }
 0x17c   : > { %1660 = vmatprep.subr.bf16.mxu0 %v2011_v51  ;;  %v1454_v40 = vmul.f32 0.25, %v1450_v5 }
 0x17d   : > { %v2274_v38 = vpop.eup %2273  ;;  %v1610_v63 = vrot.slane %v1605_v26, %v1609_v18  ;;  %v1614_v34 = vrot.slane %v1605_v26, %v1613_v0 }
 0x17e   : > { %v2276_v3 = vpop.eup %2275  ;;  %1521 = vmatmul.mubr.f32.vlgmr.msra.gmra.mrb[0].mxu0 %v1452_v54  ;;  %v1288_v6 = vsel %vm1032_vm15, %v2274_v38, 1.0 }
 0x17f   : > { %v1289_v46 = vsel %vm1033_vm11, %v2276_v3, 1.0  ;;  %v1352_v32 = vmul.f32 %v2326_v12, %v1288_v6  ;;  %1661 = vmatpush1.bf16.msra.mxu0 %v2009_v62  ;;  %1692 = vmatprep.mubr.bf16.mxu0 %v2393_v61  ;;  %v2018_v61 = vld [vmem:[%s3244_s8 + $0x30] ss:$8 sps:$4 sm:$0xff]   ;;  %s202_s8 = sand.u32 1, %s2382_s16  }
 0x180   : > { %v1353_v28 = vmul.f32 %v2327_v45, %v1289_v46  ;;  %1662 = vmatprep.subr.bf16.mxu0 %v2014_v8  ;;  %s1790_s9 = sshll.u32 %s202_s8, 4  ;;  %s1704_s19 = scalar_lea.sflag [#allocation3], %s202_s8 }
 0x181   : > { %s204_s11 = scalar_lea.vmem [#allocation2], %s1790_s9 }
 0x182   : > { %v1958_v36 = vpack.c.bf16 %v1353_v28, %v1352_v32  ;;  %s1718_s12 = sshll.u32 %s204_s11, 4  ;;  %s4079_s12 = int_to_ptr.vmem [resolvable:$true] %s1718_s12 }
 0x183   : > { %1663 = vmatpush1.bf16.msra.mxu0 %v2012_v43  ;;  %s2328_s22 = scalar_lea.vmem %s4079_s12, 256  ;;  %p2335_p1 = scmp.lt.s32.totalorder %s4079_s12, %s2333_s27 }
 0x184   : > { %1959 = vmatpush3.bf16.msra.mxu1 %v1958_v36  ;;  %1664 = vmatprep.subr.bf16.mxu0 %v2017_v53  ;;  %p2329_p12 = scmp.ne.s32.totalorder %s4079_s12, %s2328_s22  ;;  %p2336_p2 = scmp.lt.s32.totalorder %s2334_s28, %s2328_s22 }
 0x186   : > { %p2330_p13 = pnand %p2329_p12, %p2461_p5  ;;  %p2337_p3 = por %p2336_p2, %p2335_p1 }
 0x187   : > { %1591 = vmatmul.mubr.f32.vlgmr.msra.gmra.mrb[0].mxu1 %v1454_v40  ;;  %1665 = vmatpush1.bf16.msra.mxu0 %v2015_v9 }
 0x188   : > { %1666 = vmatprep.subr.bf16.mxu0 %v2020_v25  ;;  %p2331_p0 = pneg %p2330_p13 }
 0x18a   : > { %p2338_p4 = pnand %p2337_p3, %p2331_p0 }
 0x18b   : > { %1667 = vmatpush1.bf16.msra.mxu0 %v2018_v61 }
 0x251   : > { %v1858_v15 = vpop.f32.mrb[0].mxu0 }
 0x252   : > { %v1859_v47 = vpop.f32.mrb[1].mxu0 }
 0x253   : > { %v1860_v60 = vadd.f32 %v1859_v47, %v1858_v15 }
 0x25a   : > { %v1893_v58 = vpop.f32.mrb[0].mxu1 }
 0x25b   : > { %v1894_v21 = vpop.f32.mrb[1].mxu1 }
 0x25c   : > { %v1895_v2 = vadd.f32 %v1894_v21, %v1893_v58 }
 0x25e   : > { %v1593_v30 = vadd.f32 %v1895_v2, %v1860_v60 }
 0x260   : > { %v1596_v55 = vpack.c.bf16 %v1593_v30, %v1593_v30 }
 0x262   : > { %1818 = vmatmul.mubr.msk.bf16.vlgmr.msra.gmra.mrb[4].mxu0 %vm345_vm0, %v1596_v55 }
 0x335   : > { %v1694_v49 = vpop.f32.mrb[4].mxu0 }
 0x336   : > { %v1695_v10 = vadd.f32 %v1694_v49, %v1610_v63  ;;  %v1696_v1 = vpop.f32.mrb[5].mxu0 }
 0x337   : > { %v1697_v29 = vadd.f32 %v1696_v1, %v1614_v34  ;;  %v1698_v17 = vpop.f32.mrb[6].mxu0 }
 0x338   : > { %1701 = vst [vmem:[%s204_s11] sm:$0xff] %v1695_v10  ;;  %v1699_v11 = vpop.f32.mrb[7].mxu0 }
 0x339   : > { %1702 = vst [vmem:[%s204_s11 + $0x8] sm:$0xff] %v1697_v29 }
 0x33a   : > { %2341 = shalt.err (!%p2338_p4)
}
 0x33b   : > { %s2342_s29 = scalar_lea.hbm %s4077_s20, 256  ;;  %s2346_s5 = scalar_lea.hbm %s4123_s4, 512 }
 0x33c   : > { %p2343_p7 = scmp.ne.s32.totalorder %s4077_s20, %s2342_s29  ;;  %p2347_p10 = scmp.lt.u32.totalorder %s4077_s20, %s4123_s4 }
 0x33d   : > { %p2348_p11 = scmp.lt.u32.totalorder %s2346_s5, %s2342_s29  ;;  %p2350_p13 = scmp.lt.u32.totalorder %s2342_s29, %s4077_s20 }
 0x33e   : > { %p2344_p8 = pnand %p2343_p7, %p2461_p5 }
 0x33f   : > { %p2349_p12 = por %p2348_p11, %p2347_p10 }
 0x340   : > { %p2345_p9 = pneg %p2344_p8 }
 0x341   : > { %p2351_p0 = por %p2350_p13, %p2349_p12 }
 0x343   : > { %p2352_p1 = pnand %p2351_p0, %p2345_p9 }
 0x345   : > { %2355 = shalt.err (!%p2352_p1)
}
 0x346   : > { %1960 = dma.vmem_to_hbm [thread:$0]  (%p2461_p5), %s4079_s12, 256, %s4077_s20, %s1704_s19  }
 0x347 PF: > { %p1966_p2 = scmp.ge.s32.totalorder %s2390_s18, 2  ;;  %s1730_s9 = sand.u32 1, %s2378_s15  }
 0x348   : > { %s1731_s10 = scalar_lea.sflag [#allocation3], %s1730_s9 }
 0x349   : > { %p1963_p3 = pnand %p1966_p2, %p2465_p6 }
 0x34b   : > { %2373 = dma.done.wait (!%p1963_p3), %s1731_s10, 256  }
 0x34c   : > { %2375 = vsyncadd (!%p1963_p3), %s1731_s10, 4294967040  ;;  %p14_p4 = scmp.ge.s32.totalorder %s2448_s21, 4   ;;  %s4126_s15 = smov %s2382_s16 }
 0x34d   : > { %s4127_s16 = smov %s2386_s17  ;;  %s4128_s17 = smov %s2459_s24 }
 0x34e   : > { %s4129_s18 = smov %s2448_s21  ;;  %16 = sbr.rel (!%p14_p4) target bundleno = 3 (0x3), region = 74 }
 0x355   :  { %1736 = vsyncpa [#allocation3], 1 }
 0x356   :  { %1738 = vsyncpa [#allocation3 + $0x1], 1 }

</bundles_post_ra>
